<compile_context>
chip_gen: v6e
topology: v6e:2x2x1
jax: 0.10.0
libtpu: 0.0.40
codegen_flags: <defaults>
</compile_context>

<pallas_src>
import functools

import jax
import jax.numpy as jnp
from jax.experimental import pallas as pl
from jax.experimental.pallas import tpu as pltpu

F32 = jnp.float32
EPS = 1e-5
NEG = -1e30   # additive max-mask sentinel (f32-safe)


# ----------------------------------------------------------------------------
# Shared math helpers (pure jnp; used inside the Pallas kernel and in the
# plain-JAX reference used for the correctness check).
# ----------------------------------------------------------------------------
def _bn_relu(x, gamma, beta):
    """BatchNorm1d over the node axis (batch stats, biased var) + ReLU."""
    mean = jnp.mean(x, axis=0, keepdims=True)
    var = jnp.mean((x - mean) ** 2, axis=0, keepdims=True)
    y = (x - mean) * jax.lax.rsqrt(var + EPS)
    return jnp.maximum(y * gamma + beta, 0.0)


def _sage(x, mask, wl, bl, wr, inv_deg=None):
    """PyG SAGEConv: lin_l(mean_{j in N(i)} x_j) + lin_r(x_i)."""
    if inv_deg is None:
        deg = jnp.sum(mask, axis=1, keepdims=True)
        inv_deg = 1.0 / jnp.maximum(deg, 1.0)
    agg = jnp.dot(mask, x, preferred_element_type=F32) * inv_deg
    return (jnp.dot(agg, wl, preferred_element_type=F32) + bl
            + jnp.dot(x, wr, preferred_element_type=F32))


def _edgeconv_ref(x, mask, w1a, w1b, b1, w2, b2):
    """Reference EdgeConv (max aggr), where/select formulation."""
    a = jnp.dot(x, w1a)
    b = jnp.dot(x, w1b)
    base = a - b + b1
    h1 = jnp.maximum(base[:, None, :] + b[None, :, :], 0.0)
    n, _, c = h1.shape
    h2 = (jnp.dot(h1.reshape(n * n, c), w2) + b2).reshape(n, n, -1)
    neg = jnp.full_like(h2, NEG)
    agg = jnp.max(jnp.where(mask[:, :, None] > 0, h2, neg), axis=1)
    deg = jnp.sum(mask, axis=1, keepdims=True)
    return jnp.where(deg > 0, agg, 0.0)


# ----------------------------------------------------------------------------
# Fused Pallas kernel: one grid step == one graph branch (mf / mb / ma).
# ----------------------------------------------------------------------------
def voxgnn_fused_kernel(
    # shared (constant block index -> DMA'd into VMEM once, reused by all steps)
    xv_ref, xa_ref, xc_ref,
    w011_ref, b011_ref, w012_ref, b012_ref, w013_ref, b013_ref,
    g0_ref, be0_ref,
    wl21_ref, bl21_ref, wr21_ref, g21_ref, be21_ref,
    # per-branch (leading axis 3 selected by the grid index, squeezed out)
    mask_ref, ew1a_ref, ew1b_ref, eb1_ref, ew2_ref, eb2_ref,
    g1_ref, be1_ref, wl3_ref, bl3_ref, wr3_ref,
    # output: this branch's layer3x result
    o_ref,
):
    # ---- shared embedding (3x Linear + BN + ReLU). Recomputed per branch: it is
    # a handful of (N, ~24)@(~24, C) matmuls, negligible, and recomputation keeps
    # the branch grid axis fully "parallel" for v7x megacore sharding (a shared
    # VMEM-scratch carry would force "arbitrary" and serialize the branches).
    h = (jnp.dot(xv_ref[...], w011_ref[...], preferred_element_type=F32) + b011_ref[...]
         + jnp.dot(xa_ref[...], w012_ref[...], preferred_element_type=F32) + b012_ref[...]
         + jnp.dot(xc_ref[...], w013_ref[...], preferred_element_type=F32) + b013_ref[...])
    h = _bn_relu(h, g0_ref[...], be0_ref[...])

    # ---- per-branch graph structure: degree + reciprocal + additive max-mask,
    # computed ONCE and reused by EdgeConv, layer21 SAGE and the final SAGE.
    mask = mask_ref[...]                                     # (N, N)
    deg = jnp.sum(mask, axis=1, keepdims=True)               # (N, 1)
    inv_deg = 1.0 / jnp.maximum(deg, 1.0)
    neg_bias = ((1.0 - mask) * NEG)[:, :, None]              # (N, N, 1)

    # ---- EdgeConv (max aggregation) + BN + ReLU
    a = jnp.dot(h, ew1a_ref[...], preferred_element_type=F32)
    bterm = jnp.dot(h, ew1b_ref[...], preferred_element_type=F32)
    base = a - bterm + eb1_ref[...]                          # per-target term (N, C)
    h1 = jnp.maximum(base[:, None, :] + bterm[None, :, :], 0.0)   # (N, N, C)
    n, _, c = h1.shape
    # NOTE: Mosaic's dot_general lowering wants 2-D (or leading-batch) operands, so
    # contract through an (N*N, C) view; the single big matmul feeds the MXU better
    # than N tiny per-row matmuls at these sizes.
    h2 = jnp.dot(h1.reshape(n * n, c), ew2_ref[...],
                 preferred_element_type=F32).reshape(n, n, -1)
    # eb2 is constant along the neighbor axis -> add it AFTER the masked max
    # (saves an (N, N, C) broadcast add on the N^2 path).
    agg = jnp.max(h2 + neg_bias, axis=1) + eb2_ref[...]      # masked max, no select
    agg = jnp.where(deg > 0, agg, 0.0)                       # empty neighborhood -> 0
    z = _bn_relu(agg, g1_ref[...], be1_ref[...])

    # ---- layer21 SAGEConv (weights shared by all branches) + BN + ReLU
    z = _bn_relu(
        _sage(z, mask, wl21_ref[...], bl21_ref[...], wr21_ref[...], inv_deg),
        g21_ref[...], be21_ref[...])

    # ---- final per-branch SAGEConv (layer31 / layer32 / layer33)
    o_ref[...] = _sage(z, mask, wl3_ref[...], bl3_ref[...], wr3_ref[...], inv_deg)


# ----------------------------------------------------------------------------
# Graph glue + full forward (single pallas_call)
# ----------------------------------------------------------------------------
def build_mask(edge_index, keep, n):
    src, dst = edge_index[0], edge_index[1]
    m = jnp.zeros((n, n), F32)
    return m.at[dst, src].max(keep.astype(F32))


def voxgnn_forward(params, x, edge_index, edge_attr, cfg):
    d_pre = cfg['pre_computed_features']
    feature_dim = x.shape[1] - d_pre
    half = feature_dim // cfg['num_modality']
    xv = x[:, :half]
    xa = x[:, half:feature_dim]          # == x[:, half:-d_pre]
    xc = x[:, feature_dim:]
    n = x.shape[0]

    mf = build_mask(edge_index, edge_attr <= 0, n)          # forward edges
    mb = build_mask(edge_index, edge_attr >= 0, n)          # backward edges
    ma = build_mask(edge_index, jnp.ones_like(edge_attr, dtype=bool), n)
    masks = jnp.stack([mf, mb, ma])                         # (3, N, N)

    # Stack branch-specific params along a leading axis of 3.
    ec = (params['ec11'], params['ec12'], params['ec13'])
    bn1 = (params['bn11'], params['bn12'], params['bn13'])
    l3 = (params['l31'], params['l32'], params['l33'])
    ew1a = jnp.stack([e[0] for e in ec])                    # (3, C, C)
    ew1b = jnp.stack([e[1] for e in ec])                    # (3, C, C)
    eb1 = jnp.stack([e[2] for e in ec])                     # (3, 1, C)
    ew2 = jnp.stack([e[3] for e in ec])                     # (3, C, C)
    eb2 = jnp.stack([e[4] for e in ec])                     # (3, 1, C)
    g1 = jnp.stack([b[0] for b in bn1])                     # (3, 1, C)
    be1 = jnp.stack([b[1] for b in bn1])                    # (3, 1, C)
    wl3 = jnp.stack([p[0] for p in l3])                     # (3, C1, fd)
    bl3 = jnp.stack([p[1] for p in l3])                     # (3, 1, fd)
    wr3 = jnp.stack([p[2] for p in l3])                     # (3, C1, fd)

    shared_arrays = (xv, xa, xc,
                     *params['l011'], *params['l012'], *params['l013'],
                     *params['bn01'],
                     *params['l21'], *params['bn21'])
    branch_arrays = (masks, ew1a, ew1b, eb1, ew2, eb2, g1, be1, wl3, bl3, wr3)

    def shared_spec(arr):
        nd = arr.ndim
        return pl.BlockSpec(arr.shape, lambda b, _nd=nd: (0,) * _nd)

    def branch_spec(arr):
        rest = tuple(arr.shape[1:])
        nrest = len(rest)
        return pl.BlockSpec((None,) + rest, lambda b, _n=nrest: (b,) + (0,) * _n)

    fd = wl3.shape[-1]
    out3 = pl.pallas_call(
        voxgnn_fused_kernel,
        out_shape=jax.ShapeDtypeStruct((3, n, fd), F32),
        grid_spec=pltpu.PrefetchScalarGridSpec(
            num_scalar_prefetch=0,
            grid=(3,),                                      # one step per graph branch
            in_specs=[shared_spec(a) for a in shared_arrays]
                     + [branch_spec(a) for a in branch_arrays],
            out_specs=pl.BlockSpec((None, n, fd), lambda b: (b, 0, 0)),
        ),
        compiler_params=pltpu.CompilerParams(
            dimension_semantics=("parallel",)),             # v7x: branches split across TCs
    )(*shared_arrays, *branch_arrays)

    # layer31(x1) + layer32(x2) + layer33(x3): tiny (3, N, final_dim) reduction.
    return out3[0] + out3[1] + out3[2]


def voxgnn_reference(params, x, edge_index, edge_attr, cfg):
    """Pure-jnp reference (identical math, no Pallas) for a sanity check."""
    d_pre = cfg['pre_computed_features']
    feature_dim = x.shape[1] - d_pre
    half = feature_dim // cfg['num_modality']
    xv, xa, xc = x[:, :half], x[:, half:feature_dim], x[:, feature_dim:]
    n = x.shape[0]
    mf = build_mask(edge_index, edge_attr <= 0, n)
    mb = build_mask(edge_index, edge_attr >= 0, n)
    ma = build_mask(edge_index, jnp.ones_like(edge_attr, dtype=bool), n)

    def lin(z, p):
        return jnp.dot(z, p[0]) + p[1]

    h = _bn_relu(lin(xv, params['l011']) + lin(xa, params['l012'])
                 + lin(xc, params['l013']), *params['bn01'])

    def branch(mask, ec, bn_ec):
        z = _bn_relu(_edgeconv_ref(h, mask, *ec), *bn_ec)
        return _bn_relu(_sage(z, mask, *params['l21']), *params['bn21'])

    x1 = branch(mf, params['ec11'], params['bn11'])
    x2 = branch(mb, params['ec12'], params['bn12'])
    x3 = branch(ma, params['ec13'], params['bn13'])
    return (_sage(x1, mf, *params['l31']) + _sage(x2, mb, *params['l32'])
            + _sage(x3, ma, *params['l33']))


# ----------------------------------------------------------------------------
# Deterministic parameter init (matches module shapes; synthetic weights)
# ----------------------------------------------------------------------------
def init_params(key, cfg, d_vis, d_aud, d_pre):
    c0, c1, fd = cfg['channel1'], cfg['channel2'], cfg['final_dim']
    keys = iter(jax.random.split(key, 64))

    def lin(din, dout, bias=True):
        w = jax.random.normal(next(keys), (din, dout), F32) / jnp.sqrt(float(din))
        if not bias:
            return (w,)
        b = 0.05 * jax.random.normal(next(keys), (1, dout), F32)
        return (w, b)

    def bn(c):
        g = 1.0 + 0.1 * jax.random.normal(next(keys), (1, c), F32)
        b = 0.1 * jax.random.normal(next(keys), (1, c), F32)
        return (g, b)

    def edge(c):
        # Sequential(Linear(2c, c), ReLU, Linear(c, c)); split W1 into x_i / (x_j-x_i) halves
        w1 = jax.random.normal(next(keys), (2 * c, c), F32) / jnp.sqrt(2.0 * c)
        b1 = 0.05 * jax.random.normal(next(keys), (1, c), F32)
        w2 = jax.random.normal(next(keys), (c, c), F32) / jnp.sqrt(float(c))
        b2 = 0.05 * jax.random.normal(next(keys), (1, c), F32)
        return (w1[:c], w1[c:], b1, w2, b2)

    def sage(din, dout):
        wl, bl = lin(din, dout)
        (wr,) = lin(din, dout, bias=False)
        return (wl, bl, wr)

    return dict(
        l011=lin(d_vis, c0), l012=lin(d_aud, c0), l013=lin(d_pre, c0),
        bn01=bn(c0),
        ec11=edge(c0), bn11=bn(c0),
        ec12=edge(c0), bn12=bn(c0),
        ec13=edge(c0), bn13=bn(c0),
        l21=sage(c0, c1), bn21=bn(c1),
        l31=sage(c1, fd), l32=sage(c1, fd), l33=sage(c1, fd),
    )


# ----------------------------------------------------------------------------
if __name__ == "__main__":
    cfg = dict(use_spf=False, use_ref=False, num_modality=2,
               pre_computed_features=8, channel1=32, channel2=32,
               final_dim=16, num_att_heads=0, dropout=0.2)

    N = 16
    d_vis, d_aud, d_pre = 24, 24, cfg['pre_computed_features']
    D = d_vis + d_aud + d_pre            # 56

    key = jax.random.PRNGKey(0)
    kx, kp = jax.random.split(key)
    x = jax.random.normal(kx, (N, D), F32)

    # Edges: self loops (attr 0), i -> i+1 (attr -1, "forward"), i -> i+2 (attr +1, "backward")
    nodes = jnp.arange(N, dtype=jnp.int32)
    src = jnp.concatenate([nodes, nodes, nodes])
    dst = jnp.concatenate([nodes, (nodes + 1) % N, (nodes + 2) % N])
    edge_index = jnp.stack([src, dst])                     # (2, 3N)
    edge_attr = jnp.concatenate([jnp.zeros(N), -jnp.ones(N), jnp.ones(N)]).astype(F32)

    params = init_params(kp, cfg, d_vis, d_aud, d_pre)

    forward = jax.jit(functools.partial(voxgnn_forward, cfg=cfg))
    out = jax.block_until_ready(forward(params, x, edge_index, edge_attr))

    ref = voxgnn_reference(params, x, edge_index, edge_attr, cfg)
    assert out.shape == (N, cfg['final_dim'])
    assert bool(jnp.allclose(out, ref, atol=1e-4, rtol=1e-4)), "mismatch vs jnp reference"

    print("KERNEL_OK")
</pallas_src>

<mosaic_0001>
module attributes {stable_mosaic.version = 11 : i64} {
  func.func private @main(%arg0: i32) attributes {dimension_semantics = [#tpu.dimension_semantics<core_parallel>], iteration_bounds = array<i64: 2>, tpu.core_type = #tpu.core_type<sc_scalar_subcore>, window_params = []} {
    return
  }
}

module attributes {stable_mosaic.version = 11 : i64} {
  func.func private @main(%arg0: i32) attributes {dimension_semantics = [#tpu.dimension_semantics<core_parallel>], iteration_bounds = array<i64: 2>, tpu.core_type = #tpu.core_type<sc_scalar_subcore>, window_params = []} {
    return
  }
}

module attributes {stable_mosaic.version = 11 : i64} {
  func.func @voxgnn_fused_kernel(%arg0: i32, %arg1: memref<16x24xf32, #tpu.memory_space<vmem>>, %arg2: memref<16x24xf32, #tpu.memory_space<vmem>>, %arg3: memref<16x8xf32, #tpu.memory_space<vmem>>, %arg4: memref<24x32xf32, #tpu.memory_space<vmem>>, %arg5: memref<1x32xf32, #tpu.memory_space<vmem>>, %arg6: memref<24x32xf32, #tpu.memory_space<vmem>>, %arg7: memref<1x32xf32, #tpu.memory_space<vmem>>, %arg8: memref<8x32xf32, #tpu.memory_space<vmem>>, %arg9: memref<1x32xf32, #tpu.memory_space<vmem>>, %arg10: memref<1x32xf32, #tpu.memory_space<vmem>>, %arg11: memref<1x32xf32, #tpu.memory_space<vmem>>, %arg12: memref<32x32xf32, #tpu.memory_space<vmem>>, %arg13: memref<1x32xf32, #tpu.memory_space<vmem>>, %arg14: memref<32x32xf32, #tpu.memory_space<vmem>>, %arg15: memref<1x32xf32, #tpu.memory_space<vmem>>, %arg16: memref<1x32xf32, #tpu.memory_space<vmem>>, %arg17: memref<1x16x16xf32, #tpu.memory_space<vmem>>, %arg18: memref<1x32x32xf32, #tpu.memory_space<vmem>>, %arg19: memref<1x32x32xf32, #tpu.memory_space<vmem>>, %arg20: memref<1x1x32xf32, #tpu.memory_space<vmem>>, %arg21: memref<1x32x32xf32, #tpu.memory_space<vmem>>, %arg22: memref<1x1x32xf32, #tpu.memory_space<vmem>>, %arg23: memref<1x1x32xf32, #tpu.memory_space<vmem>>, %arg24: memref<1x1x32xf32, #tpu.memory_space<vmem>>, %arg25: memref<1x32x16xf32, #tpu.memory_space<vmem>>, %arg26: memref<1x1x16xf32, #tpu.memory_space<vmem>>, %arg27: memref<1x32x16xf32, #tpu.memory_space<vmem>>, %arg28: memref<1x16x16xf32, #tpu.memory_space<vmem>>) attributes {dimension_semantics = [#tpu.dimension_semantics<parallel>], iteration_bounds = array<i64: 3>, scalar_prefetch = 0 : i64, scratch_operands = 0 : i64, tpu.core_type = #tpu.core_type<tc>, window_params = [{pipeline_mode = #tpu.pipeline_mode<synchronous>, transform_indices = @transform_0, window_bounds = array<i64: 16, 24>}, {pipeline_mode = #tpu.pipeline_mode<synchronous>, transform_indices = @transform_1, window_bounds = array<i64: 16, 24>}, {pipeline_mode = #tpu.pipeline_mode<synchronous>, transform_indices = @transform_2, window_bounds = array<i64: 16, 8>}, {pipeline_mode = #tpu.pipeline_mode<synchronous>, transform_indices = @transform_3, window_bounds = array<i64: 24, 32>}, {pipeline_mode = #tpu.pipeline_mode<synchronous>, transform_indices = @transform_4, window_bounds = array<i64: 1, 32>}, {pipeline_mode = #tpu.pipeline_mode<synchronous>, transform_indices = @transform_5, window_bounds = array<i64: 24, 32>}, {pipeline_mode = #tpu.pipeline_mode<synchronous>, transform_indices = @transform_6, window_bounds = array<i64: 1, 32>}, {pipeline_mode = #tpu.pipeline_mode<synchronous>, transform_indices = @transform_7, window_bounds = array<i64: 8, 32>}, {pipeline_mode = #tpu.pipeline_mode<synchronous>, transform_indices = @transform_8, window_bounds = array<i64: 1, 32>}, {pipeline_mode = #tpu.pipeline_mode<synchronous>, transform_indices = @transform_9, window_bounds = array<i64: 1, 32>}, {pipeline_mode = #tpu.pipeline_mode<synchronous>, transform_indices = @transform_10, window_bounds = array<i64: 1, 32>}, {pipeline_mode = #tpu.pipeline_mode<synchronous>, transform_indices = @transform_11, window_bounds = array<i64: 32, 32>}, {pipeline_mode = #tpu.pipeline_mode<synchronous>, transform_indices = @transform_12, window_bounds = array<i64: 1, 32>}, {pipeline_mode = #tpu.pipeline_mode<synchronous>, transform_indices = @transform_13, window_bounds = array<i64: 32, 32>}, {pipeline_mode = #tpu.pipeline_mode<synchronous>, transform_indices = @transform_14, window_bounds = array<i64: 1, 32>}, {pipeline_mode = #tpu.pipeline_mode<synchronous>, transform_indices = @transform_15, window_bounds = array<i64: 1, 32>}, {transform_indices = @transform_16, window_bounds = array<i64: 1, 16, 16>}, {transform_indices = @transform_17, window_bounds = array<i64: 1, 32, 32>}, {transform_indices = @transform_18, window_bounds = array<i64: 1, 32, 32>}, {transform_indices = @transform_19, window_bounds = array<i64: 1, 1, 32>}, {transform_indices = @transform_20, window_bounds = array<i64: 1, 32, 32>}, {transform_indices = @transform_21, window_bounds = array<i64: 1, 1, 32>}, {transform_indices = @transform_22, window_bounds = array<i64: 1, 1, 32>}, {transform_indices = @transform_23, window_bounds = array<i64: 1, 1, 32>}, {transform_indices = @transform_24, window_bounds = array<i64: 1, 32, 16>}, {transform_indices = @transform_25, window_bounds = array<i64: 1, 1, 16>}, {transform_indices = @transform_26, window_bounds = array<i64: 1, 32, 16>}, {transform_indices = @transform_27, window_bounds = array<i64: 1, 16, 16>}]} {
    %c0 = arith.constant 0 : index
    %c0_0 = arith.constant 0 : index
    %0 = vector.load %arg1[%c0, %c0_0] : memref<16x24xf32, #tpu.memory_space<vmem>>, vector<16x24xf32>
    %c0_1 = arith.constant 0 : index
    %c0_2 = arith.constant 0 : index
    %1 = vector.load %arg4[%c0_1, %c0_2] : memref<24x32xf32, #tpu.memory_space<vmem>>, vector<24x32xf32>
    %cst = arith.constant dense<0.000000e+00> : vector<16x32xf32>
    %2 = tpu.matmul %0, %1, %cst {dimension_numbers = #tpu.dot_dimension_numbers<[1], [0], [0], [1], [0, 0, 1, 1], [], []>} : vector<16x24xf32>, vector<24x32xf32>, vector<16x32xf32> -> vector<16x32xf32>
    %c0_3 = arith.constant 0 : index
    %c0_4 = arith.constant 0 : index
    %3 = vector.load %arg5[%c0_3, %c0_4] : memref<1x32xf32, #tpu.memory_space<vmem>>, vector<1x32xf32>
    %4 = vector.broadcast %3 : vector<1x32xf32> to vector<16x32xf32>
    %5 = arith.addf %2, %4 : vector<16x32xf32>
    %c0_5 = arith.constant 0 : index
    %c0_6 = arith.constant 0 : index
    %6 = vector.load %arg2[%c0_5, %c0_6] : memref<16x24xf32, #tpu.memory_space<vmem>>, vector<16x24xf32>
    %c0_7 = arith.constant 0 : index
    %c0_8 = arith.constant 0 : index
    %7 = vector.load %arg6[%c0_7, %c0_8] : memref<24x32xf32, #tpu.memory_space<vmem>>, vector<24x32xf32>
    %cst_9 = arith.constant dense<0.000000e+00> : vector<16x32xf32>
    %8 = tpu.matmul %6, %7, %cst_9 {dimension_numbers = #tpu.dot_dimension_numbers<[1], [0], [0], [1], [0, 0, 1, 1], [], []>} : vector<16x24xf32>, vector<24x32xf32>, vector<16x32xf32> -> vector<16x32xf32>
    %9 = arith.addf %5, %8 : vector<16x32xf32>
    %c0_10 = arith.constant 0 : index
    %c0_11 = arith.constant 0 : index
    %10 = vector.load %arg7[%c0_10, %c0_11] : memref<1x32xf32, #tpu.memory_space<vmem>>, vector<1x32xf32>
    %11 = vector.broadcast %10 : vector<1x32xf32> to vector<16x32xf32>
    %12 = arith.addf %9, %11 : vector<16x32xf32>
    %c0_12 = arith.constant 0 : index
    %c0_13 = arith.constant 0 : index
    %13 = vector.load %arg3[%c0_12, %c0_13] : memref<16x8xf32, #tpu.memory_space<vmem>>, vector<16x8xf32>
    %c0_14 = arith.constant 0 : index
    %c0_15 = arith.constant 0 : index
    %14 = vector.load %arg8[%c0_14, %c0_15] : memref<8x32xf32, #tpu.memory_space<vmem>>, vector<8x32xf32>
    %cst_16 = arith.constant dense<0.000000e+00> : vector<16x32xf32>
    %15 = tpu.matmul %13, %14, %cst_16 {dimension_numbers = #tpu.dot_dimension_numbers<[1], [0], [0], [1], [0, 0, 1, 1], [], []>} : vector<16x8xf32>, vector<8x32xf32>, vector<16x32xf32> -> vector<16x32xf32>
    %16 = arith.addf %12, %15 : vector<16x32xf32>
    %c0_17 = arith.constant 0 : index
    %c0_18 = arith.constant 0 : index
    %17 = vector.load %arg9[%c0_17, %c0_18] : memref<1x32xf32, #tpu.memory_space<vmem>>, vector<1x32xf32>
    %18 = vector.broadcast %17 : vector<1x32xf32> to vector<16x32xf32>
    %19 = arith.addf %16, %18 : vector<16x32xf32>
    %c0_19 = arith.constant 0 : index
    %c0_20 = arith.constant 0 : index
    %20 = vector.load %arg10[%c0_19, %c0_20] : memref<1x32xf32, #tpu.memory_space<vmem>>, vector<1x32xf32>
    %c0_21 = arith.constant 0 : index
    %c0_22 = arith.constant 0 : index
    %21 = vector.load %arg11[%c0_21, %c0_22] : memref<1x32xf32, #tpu.memory_space<vmem>>, vector<1x32xf32>
    %cst_23 = arith.constant dense<0.000000e+00> : vector<32xf32>
    %22 = vector.multi_reduction <add>, %19, %cst_23 [0] : vector<16x32xf32> to vector<32xf32>
    %23 = vector.shape_cast %22 : vector<32xf32> to vector<1x32xf32>
    %cst_24 = arith.constant 1.600000e+01 : f32
    %24 = vector.broadcast %cst_24 : f32 to vector<1x32xf32>
    %25 = arith.divf %23, %24 : vector<1x32xf32>
    %26 = vector.broadcast %25 : vector<1x32xf32> to vector<16x32xf32>
    %27 = arith.subf %19, %26 : vector<16x32xf32>
    %28 = arith.mulf %27, %27 : vector<16x32xf32>
    %cst_25 = arith.constant dense<0.000000e+00> : vector<32xf32>
    %29 = vector.multi_reduction <add>, %28, %cst_25 [0] : vector<16x32xf32> to vector<32xf32>
    %30 = vector.shape_cast %29 : vector<32xf32> to vector<1x32xf32>
    %cst_26 = arith.constant 1.600000e+01 : f32
    %31 = vector.broadcast %cst_26 : f32 to vector<1x32xf32>
    %32 = arith.divf %30, %31 : vector<1x32xf32>
    %33 = vector.broadcast %25 : vector<1x32xf32> to vector<16x32xf32>
    %34 = arith.subf %19, %33 : vector<16x32xf32>
    %cst_27 = arith.constant 9.99999974E-6 : f32
    %35 = vector.broadcast %cst_27 : f32 to vector<1x32xf32>
    %36 = arith.addf %32, %35 : vector<1x32xf32>
    %37 = math.rsqrt %36 : vector<1x32xf32>
    %38 = vector.broadcast %37 : vector<1x32xf32> to vector<16x32xf32>
    %39 = arith.mulf %34, %38 : vector<16x32xf32>
    %40 = vector.broadcast %20 : vector<1x32xf32> to vector<16x32xf32>
    %41 = arith.mulf %39, %40 : vector<16x32xf32>
    %42 = vector.broadcast %21 : vector<1x32xf32> to vector<16x32xf32>
    %43 = arith.addf %41, %42 : vector<16x32xf32>
    %cst_28 = arith.constant 0.000000e+00 : f32
    %44 = vector.broadcast %cst_28 : f32 to vector<16x32xf32>
    %45 = arith.maximumf %43, %44 : vector<16x32xf32>
    %c0_29 = arith.constant 0 : index
    %c0_30 = arith.constant 0 : index
    %c0_31 = arith.constant 0 : index
    %46 = vector.load %arg17[%c0_29, %c0_30, %c0_31] : memref<1x16x16xf32, #tpu.memory_space<vmem>>, vector<1x16x16xf32>
    %47 = vector.shape_cast %46 : vector<1x16x16xf32> to vector<16x16xf32>
    %cst_32 = arith.constant dense<0.000000e+00> : vector<16xf32>
    %48 = vector.multi_reduction <add>, %47, %cst_32 [1] : vector<16x16xf32> to vector<16xf32>
    %49 = vector.shape_cast %48 : vector<16xf32> to vector<16x1xf32>
    %cst_33 = arith.constant 1.000000e+00 : f32
    %50 = vector.broadcast %cst_33 : f32 to vector<16x1xf32>
    %51 = arith.maximumf %49, %50 : vector<16x1xf32>
    %cst_34 = arith.constant 1.000000e+00 : f32
    %52 = vector.broadcast %cst_34 : f32 to vector<16x1xf32>
    %53 = arith.divf %52, %51 : vector<16x1xf32>
    %cst_35 = arith.constant 1.000000e+00 : f32
    %54 = vector.broadcast %cst_35 : f32 to vector<16x16xf32>
    %55 = arith.subf %54, %47 : vector<16x16xf32>
    %cst_36 = arith.constant -1.000000e+30 : f32
    %56 = vector.broadcast %cst_36 : f32 to vector<16x16xf32>
    %57 = arith.mulf %55, %56 : vector<16x16xf32>
    %58 = vector.shape_cast %57 : vector<16x16xf32> to vector<16x16x1xf32>
    %c0_37 = arith.constant 0 : index
    %c0_38 = arith.constant 0 : index
    %c0_39 = arith.constant 0 : index
    %59 = vector.load %arg18[%c0_37, %c0_38, %c0_39] : memref<1x32x32xf32, #tpu.memory_space<vmem>>, vector<1x32x32xf32>
    %60 = vector.shape_cast %59 : vector<1x32x32xf32> to vector<32x32xf32>
    %cst_40 = arith.constant dense<0.000000e+00> : vector<16x32xf32>
    %61 = tpu.matmul %45, %60, %cst_40 {dimension_numbers = #tpu.dot_dimension_numbers<[1], [0], [0], [1], [0, 0, 1, 1], [], []>} : vector<16x32xf32>, vector<32x32xf32>, vector<16x32xf32> -> vector<16x32xf32>
    %c0_41 = arith.constant 0 : index
    %c0_42 = arith.constant 0 : index
    %c0_43 = arith.constant 0 : index
    %62 = vector.load %arg19[%c0_41, %c0_42, %c0_43] : memref<1x32x32xf32, #tpu.memory_space<vmem>>, vector<1x32x32xf32>
    %63 = vector.shape_cast %62 : vector<1x32x32xf32> to vector<32x32xf32>
    %cst_44 = arith.constant dense<0.000000e+00> : vector<16x32xf32>
    %64 = tpu.matmul %45, %63, %cst_44 {dimension_numbers = #tpu.dot_dimension_numbers<[1], [0], [0], [1], [0, 0, 1, 1], [], []>} : vector<16x32xf32>, vector<32x32xf32>, vector<16x32xf32> -> vector<16x32xf32>
    %65 = arith.subf %61, %64 : vector<16x32xf32>
    %c0_45 = arith.constant 0 : index
    %c0_46 = arith.constant 0 : index
    %c0_47 = arith.constant 0 : index
    %66 = vector.load %arg20[%c0_45, %c0_46, %c0_47] : memref<1x1x32xf32, #tpu.memory_space<vmem>>, vector<1x1x32xf32>
    %67 = vector.shape_cast %66 : vector<1x1x32xf32> to vector<1x32xf32>
    %68 = vector.broadcast %67 : vector<1x32xf32> to vector<16x32xf32>
    %69 = arith.addf %65, %68 : vector<16x32xf32>
    %70 = vector.shape_cast %69 : vector<16x32xf32> to vector<16x1x32xf32>
    %71 = vector.shape_cast %64 : vector<16x32xf32> to vector<1x16x32xf32>
    %72 = vector.broadcast %70 : vector<16x1x32xf32> to vector<16x16x32xf32>
    %73 = vector.broadcast %71 : vector<1x16x32xf32> to vector<16x16x32xf32>
    %74 = arith.addf %72, %73 : vector<16x16x32xf32>
    %cst_48 = arith.constant 0.000000e+00 : f32
    %75 = vector.broadcast %cst_48 : f32 to vector<16x16x32xf32>
    %76 = arith.maximumf %74, %75 : vector<16x16x32xf32>
    %77 = vector.shape_cast %76 : vector<16x16x32xf32> to vector<256x32xf32>
    %c0_49 = arith.constant 0 : index
    %c0_50 = arith.constant 0 : index
    %c0_51 = arith.constant 0 : index
    %78 = vector.load %arg21[%c0_49, %c0_50, %c0_51] : memref<1x32x32xf32, #tpu.memory_space<vmem>>, vector<1x32x32xf32>
    %79 = vector.shape_cast %78 : vector<1x32x32xf32> to vector<32x32xf32>
    %cst_52 = arith.constant dense<0.000000e+00> : vector<256x32xf32>
    %80 = tpu.matmul %77, %79, %cst_52 {dimension_numbers = #tpu.dot_dimension_numbers<[1], [0], [0], [1], [0, 0, 1, 1], [], []>} : vector<256x32xf32>, vector<32x32xf32>, vector<256x32xf32> -> vector<256x32xf32>
    %81 = vector.shape_cast %80 : vector<256x32xf32> to vector<16x16x32xf32>
    %82 = vector.broadcast %58 : vector<16x16x1xf32> to vector<16x16x32xf32>
    %83 = arith.addf %81, %82 : vector<16x16x32xf32>
    %cst_53 = arith.constant dense<0xFF800000> : vector<16x32xf32>
    %84 = vector.multi_reduction <maximumf>, %83, %cst_53 [1] : vector<16x16x32xf32> to vector<16x32xf32>
    %c0_54 = arith.constant 0 : index
    %c0_55 = arith.constant 0 : index
    %c0_56 = arith.constant 0 : index
    %85 = vector.load %arg22[%c0_54, %c0_55, %c0_56] : memref<1x1x32xf32, #tpu.memory_space<vmem>>, vector<1x1x32xf32>
    %86 = vector.shape_cast %85 : vector<1x1x32xf32> to vector<1x32xf32>
    %87 = vector.broadcast %86 : vector<1x32xf32> to vector<16x32xf32>
    %88 = arith.addf %84, %87 : vector<16x32xf32>
    %cst_57 = arith.constant 0.000000e+00 : f32
    %89 = vector.broadcast %cst_57 : f32 to vector<16x1xf32>
    %90 = arith.cmpf ogt, %49, %89 : vector<16x1xf32>
    %cst_58 = arith.constant 0.000000e+00 : f32
    %91 = vector.shape_cast %90 : vector<16x1xi1> to vector<16x1xi1>
    %92 = vector.broadcast %91 : vector<16x1xi1> to vector<16x32xi1>
    %93 = vector.broadcast %cst_58 : f32 to vector<16x32xf32>
    %94 = arith.select %92, %88, %93 : vector<16x32xi1>, vector<16x32xf32>
    %c0_59 = arith.constant 0 : index
    %c0_60 = arith.constant 0 : index
    %c0_61 = arith.constant 0 : index
    %95 = vector.load %arg23[%c0_59, %c0_60, %c0_61] : memref<1x1x32xf32, #tpu.memory_space<vmem>>, vector<1x1x32xf32>
    %96 = vector.shape_cast %95 : vector<1x1x32xf32> to vector<1x32xf32>
    %c0_62 = arith.constant 0 : index
    %c0_63 = arith.constant 0 : index
    %c0_64 = arith.constant 0 : index
    %97 = vector.load %arg24[%c0_62, %c0_63, %c0_64] : memref<1x1x32xf32, #tpu.memory_space<vmem>>, vector<1x1x32xf32>
    %98 = vector.shape_cast %97 : vector<1x1x32xf32> to vector<1x32xf32>
    %cst_65 = arith.constant dense<0.000000e+00> : vector<32xf32>
    %99 = vector.multi_reduction <add>, %94, %cst_65 [0] : vector<16x32xf32> to vector<32xf32>
    %100 = vector.shape_cast %99 : vector<32xf32> to vector<1x32xf32>
    %cst_66 = arith.constant 1.600000e+01 : f32
    %101 = vector.broadcast %cst_66 : f32 to vector<1x32xf32>
    %102 = arith.divf %100, %101 : vector<1x32xf32>
    %103 = vector.broadcast %102 : vector<1x32xf32> to vector<16x32xf32>
    %104 = arith.subf %94, %103 : vector<16x32xf32>
    %105 = arith.mulf %104, %104 : vector<16x32xf32>
    %cst_67 = arith.constant dense<0.000000e+00> : vector<32xf32>
    %106 = vector.multi_reduction <add>, %105, %cst_67 [0] : vector<16x32xf32> to vector<32xf32>
    %107 = vector.shape_cast %106 : vector<32xf32> to vector<1x32xf32>
    %cst_68 = arith.constant 1.600000e+01 : f32
    %108 = vector.broadcast %cst_68 : f32 to vector<1x32xf32>
    %109 = arith.divf %107, %108 : vector<1x32xf32>
    %110 = vector.broadcast %102 : vector<1x32xf32> to vector<16x32xf32>
    %111 = arith.subf %94, %110 : vector<16x32xf32>
    %cst_69 = arith.constant 9.99999974E-6 : f32
    %112 = vector.broadcast %cst_69 : f32 to vector<1x32xf32>
    %113 = arith.addf %109, %112 : vector<1x32xf32>
    %114 = math.rsqrt %113 : vector<1x32xf32>
    %115 = vector.broadcast %114 : vector<1x32xf32> to vector<16x32xf32>
    %116 = arith.mulf %111, %115 : vector<16x32xf32>
    %117 = vector.broadcast %96 : vector<1x32xf32> to vector<16x32xf32>
    %118 = arith.mulf %116, %117 : vector<16x32xf32>
    %119 = vector.broadcast %98 : vector<1x32xf32> to vector<16x32xf32>
    %120 = arith.addf %118, %119 : vector<16x32xf32>
    %cst_70 = arith.constant 0.000000e+00 : f32
    %121 = vector.broadcast %cst_70 : f32 to vector<16x32xf32>
    %122 = arith.maximumf %120, %121 : vector<16x32xf32>
    %c0_71 = arith.constant 0 : index
    %c0_72 = arith.constant 0 : index
    %123 = vector.load %arg12[%c0_71, %c0_72] : memref<32x32xf32, #tpu.memory_space<vmem>>, vector<32x32xf32>
    %c0_73 = arith.constant 0 : index
    %c0_74 = arith.constant 0 : index
    %124 = vector.load %arg13[%c0_73, %c0_74] : memref<1x32xf32, #tpu.memory_space<vmem>>, vector<1x32xf32>
    %c0_75 = arith.constant 0 : index
    %c0_76 = arith.constant 0 : index
    %125 = vector.load %arg14[%c0_75, %c0_76] : memref<32x32xf32, #tpu.memory_space<vmem>>, vector<32x32xf32>
    %cst_77 = arith.constant dense<0.000000e+00> : vector<16x32xf32>
    %126 = tpu.matmul %47, %122, %cst_77 {dimension_numbers = #tpu.dot_dimension_numbers<[1], [0], [0], [1], [0, 0, 1, 1], [], []>} : vector<16x16xf32>, vector<16x32xf32>, vector<16x32xf32> -> vector<16x32xf32>
    %127 = vector.broadcast %53 : vector<16x1xf32> to vector<16x32xf32>
    %128 = arith.mulf %126, %127 : vector<16x32xf32>
    %cst_78 = arith.constant dense<0.000000e+00> : vector<16x32xf32>
    %129 = tpu.matmul %128, %123, %cst_78 {dimension_numbers = #tpu.dot_dimension_numbers<[1], [0], [0], [1], [0, 0, 1, 1], [], []>} : vector<16x32xf32>, vector<32x32xf32>, vector<16x32xf32> -> vector<16x32xf32>
    %130 = vector.broadcast %124 : vector<1x32xf32> to vector<16x32xf32>
    %131 = arith.addf %129, %130 : vector<16x32xf32>
    %cst_79 = arith.constant dense<0.000000e+00> : vector<16x32xf32>
    %132 = tpu.matmul %122, %125, %cst_79 {dimension_numbers = #tpu.dot_dimension_numbers<[1], [0], [0], [1], [0, 0, 1, 1], [], []>} : vector<16x32xf32>, vector<32x32xf32>, vector<16x32xf32> -> vector<16x32xf32>
    %133 = arith.addf %131, %132 : vector<16x32xf32>
    %c0_80 = arith.constant 0 : index
    %c0_81 = arith.constant 0 : index
    %134 = vector.load %arg15[%c0_80, %c0_81] : memref<1x32xf32, #tpu.memory_space<vmem>>, vector<1x32xf32>
    %c0_82 = arith.constant 0 : index
    %c0_83 = arith.constant 0 : index
    %135 = vector.load %arg16[%c0_82, %c0_83] : memref<1x32xf32, #tpu.memory_space<vmem>>, vector<1x32xf32>
    %cst_84 = arith.constant dense<0.000000e+00> : vector<32xf32>
    %136 = vector.multi_reduction <add>, %133, %cst_84 [0] : vector<16x32xf32> to vector<32xf32>
    %137 = vector.shape_cast %136 : vector<32xf32> to vector<1x32xf32>
    %cst_85 = arith.constant 1.600000e+01 : f32
    %138 = vector.broadcast %cst_85 : f32 to vector<1x32xf32>
    %139 = arith.divf %137, %138 : vector<1x32xf32>
    %140 = vector.broadcast %139 : vector<1x32xf32> to vector<16x32xf32>
    %141 = arith.subf %133, %140 : vector<16x32xf32>
    %142 = arith.mulf %141, %141 : vector<16x32xf32>
    %cst_86 = arith.constant dense<0.000000e+00> : vector<32xf32>
    %143 = vector.multi_reduction <add>, %142, %cst_86 [0] : vector<16x32xf32> to vector<32xf32>
    %144 = vector.shape_cast %143 : vector<32xf32> to vector<1x32xf32>
    %cst_87 = arith.constant 1.600000e+01 : f32
    %145 = vector.broadcast %cst_87 : f32 to vector<1x32xf32>
    %146 = arith.divf %144, %145 : vector<1x32xf32>
    %147 = vector.broadcast %139 : vector<1x32xf32> to vector<16x32xf32>
    %148 = arith.subf %133, %147 : vector<16x32xf32>
    %cst_88 = arith.constant 9.99999974E-6 : f32
    %149 = vector.broadcast %cst_88 : f32 to vector<1x32xf32>
    %150 = arith.addf %146, %149 : vector<1x32xf32>
    %151 = math.rsqrt %150 : vector<1x32xf32>
    %152 = vector.broadcast %151 : vector<1x32xf32> to vector<16x32xf32>
    %153 = arith.mulf %148, %152 : vector<16x32xf32>
    %154 = vector.broadcast %134 : vector<1x32xf32> to vector<16x32xf32>
    %155 = arith.mulf %153, %154 : vector<16x32xf32>
    %156 = vector.broadcast %135 : vector<1x32xf32> to vector<16x32xf32>
    %157 = arith.addf %155, %156 : vector<16x32xf32>
    %cst_89 = arith.constant 0.000000e+00 : f32
    %158 = vector.broadcast %cst_89 : f32 to vector<16x32xf32>
    %159 = arith.maximumf %157, %158 : vector<16x32xf32>
    %c0_90 = arith.constant 0 : index
    %c0_91 = arith.constant 0 : index
    %c0_92 = arith.constant 0 : index
    %160 = vector.load %arg25[%c0_90, %c0_91, %c0_92] : memref<1x32x16xf32, #tpu.memory_space<vmem>>, vector<1x32x16xf32>
    %161 = vector.shape_cast %160 : vector<1x32x16xf32> to vector<32x16xf32>
    %c0_93 = arith.constant 0 : index
    %c0_94 = arith.constant 0 : index
    %c0_95 = arith.constant 0 : index
    %162 = vector.load %arg26[%c0_93, %c0_94, %c0_95] : memref<1x1x16xf32, #tpu.memory_space<vmem>>, vector<1x1x16xf32>
    %163 = vector.shape_cast %162 : vector<1x1x16xf32> to vector<1x16xf32>
    %c0_96 = arith.constant 0 : index
    %c0_97 = arith.constant 0 : index
    %c0_98 = arith.constant 0 : index
    %164 = vector.load %arg27[%c0_96, %c0_97, %c0_98] : memref<1x32x16xf32, #tpu.memory_space<vmem>>, vector<1x32x16xf32>
    %165 = vector.shape_cast %164 : vector<1x32x16xf32> to vector<32x16xf32>
    %cst_99 = arith.constant dense<0.000000e+00> : vector<16x32xf32>
    %166 = tpu.matmul %47, %159, %cst_99 {dimension_numbers = #tpu.dot_dimension_numbers<[1], [0], [0], [1], [0, 0, 1, 1], [], []>} : vector<16x16xf32>, vector<16x32xf32>, vector<16x32xf32> -> vector<16x32xf32>
    %167 = vector.broadcast %53 : vector<16x1xf32> to vector<16x32xf32>
    %168 = arith.mulf %166, %167 : vector<16x32xf32>
    %cst_100 = arith.constant dense<0.000000e+00> : vector<16x16xf32>
    %169 = tpu.matmul %168, %161, %cst_100 {dimension_numbers = #tpu.dot_dimension_numbers<[1], [0], [0], [1], [0, 0, 1, 1], [], []>} : vector<16x32xf32>, vector<32x16xf32>, vector<16x16xf32> -> vector<16x16xf32>
    %170 = vector.broadcast %163 : vector<1x16xf32> to vector<16x16xf32>
    %171 = arith.addf %169, %170 : vector<16x16xf32>
    %cst_101 = arith.constant dense<0.000000e+00> : vector<16x16xf32>
    %172 = tpu.matmul %159, %165, %cst_101 {dimension_numbers = #tpu.dot_dimension_numbers<[1], [0], [0], [1], [0, 0, 1, 1], [], []>} : vector<16x32xf32>, vector<32x16xf32>, vector<16x16xf32> -> vector<16x16xf32>
    %173 = arith.addf %171, %172 : vector<16x16xf32>
    %c0_102 = arith.constant 0 : index
    %c0_103 = arith.constant 0 : index
    %c0_104 = arith.constant 0 : index
    %174 = vector.load %arg28[%c0_102, %c0_103, %c0_104] : memref<1x16x16xf32, #tpu.memory_space<vmem>>, vector<1x16x16xf32>
    %175 = vector.shape_cast %174 : vector<1x16x16xf32> to vector<16x16xf32>
    %176 = vector.shape_cast %173 : vector<16x16xf32> to vector<1x16x16xf32>
    tpu.vector_store %arg28[%c0_102, %c0_103, %c0_104], %176 {strides = array<i32>} : memref<1x16x16xf32, #tpu.memory_space<vmem>>, vector<1x16x16xf32>,
    return
  }
  func.func @transform_0(%arg0: i32) -> (i32, i32) {
    %c0_i32 = arith.constant 0 : i32
    %c0_i32_0 = arith.constant 0 : i32
    %c0_i32_1 = arith.constant 0 : i32
    return %c0_i32, %c0_i32_0 : i32, i32
  }
  func.func @transform_1(%arg0: i32) -> (i32, i32) {
    %c0_i32 = arith.constant 0 : i32
    %c0_i32_0 = arith.constant 0 : i32
    %c0_i32_1 = arith.constant 0 : i32
    return %c0_i32, %c0_i32_0 : i32, i32
  }
  func.func @transform_2(%arg0: i32) -> (i32, i32) {
    %c0_i32 = arith.constant 0 : i32
    %c0_i32_0 = arith.constant 0 : i32
    %c0_i32_1 = arith.constant 0 : i32
    return %c0_i32, %c0_i32_0 : i32, i32
  }
  func.func @transform_3(%arg0: i32) -> (i32, i32) {
    %c0_i32 = arith.constant 0 : i32
    %c0_i32_0 = arith.constant 0 : i32
    %c0_i32_1 = arith.constant 0 : i32
    return %c0_i32, %c0_i32_0 : i32, i32
  }
  func.func @transform_4(%arg0: i32) -> (i32, i32) {
    %c0_i32 = arith.constant 0 : i32
    %c0_i32_0 = arith.constant 0 : i32
    %c0_i32_1 = arith.constant 0 : i32
    return %c0_i32, %c0_i32_0 : i32, i32
  }
  func.func @transform_5(%arg0: i32) -> (i32, i32) {
    %c0_i32 = arith.constant 0 : i32
    %c0_i32_0 = arith.constant 0 : i32
    %c0_i32_1 = arith.constant 0 : i32
    return %c0_i32, %c0_i32_0 : i32, i32
  }
  func.func @transform_6(%arg0: i32) -> (i32, i32) {
    %c0_i32 = arith.constant 0 : i32
    %c0_i32_0 = arith.constant 0 : i32
    %c0_i32_1 = arith.constant 0 : i32
    return %c0_i32, %c0_i32_0 : i32, i32
  }
  func.func @transform_7(%arg0: i32) -> (i32, i32) {
    %c0_i32 = arith.constant 0 : i32
    %c0_i32_0 = arith.constant 0 : i32
    %c0_i32_1 = arith.constant 0 : i32
    return %c0_i32, %c0_i32_0 : i32, i32
  }
  func.func @transform_8(%arg0: i32) -> (i32, i32) {
    %c0_i32 = arith.constant 0 : i32
    %c0_i32_0 = arith.constant 0 : i32
    %c0_i32_1 = arith.constant 0 : i32
    return %c0_i32, %c0_i32_0 : i32, i32
  }
  func.func @transform_9(%arg0: i32) -> (i32, i32) {
    %c0_i32 = arith.constant 0 : i32
    %c0_i32_0 = arith.constant 0 : i32
    %c0_i32_1 = arith.constant 0 : i32
    return %c0_i32, %c0_i32_0 : i32, i32
  }
  func.func @transform_10(%arg0: i32) -> (i32, i32) {
    %c0_i32 = arith.constant 0 : i32
    %c0_i32_0 = arith.constant 0 : i32
    %c0_i32_1 = arith.constant 0 : i32
    return %c0_i32, %c0_i32_0 : i32, i32
  }
  func.func @transform_11(%arg0: i32) -> (i32, i32) {
    %c0_i32 = arith.constant 0 : i32
    %c0_i32_0 = arith.constant 0 : i32
    %c0_i32_1 = arith.constant 0 : i32
    return %c0_i32, %c0_i32_0 : i32, i32
  }
  func.func @transform_12(%arg0: i32) -> (i32, i32) {
    %c0_i32 = arith.constant 0 : i32
    %c0_i32_0 = arith.constant 0 : i32
    %c0_i32_1 = arith.constant 0 : i32
    return %c0_i32, %c0_i32_0 : i32, i32
  }
  func.func @transform_13(%arg0: i32) -> (i32, i32) {
    %c0_i32 = arith.constant 0 : i32
    %c0_i32_0 = arith.constant 0 : i32
    %c0_i32_1 = arith.constant 0 : i32
    return %c0_i32, %c0_i32_0 : i32, i32
  }
  func.func @transform_14(%arg0: i32) -> (i32, i32) {
    %c0_i32 = arith.constant 0 : i32
    %c0_i32_0 = arith.constant 0 : i32
    %c0_i32_1 = arith.constant 0 : i32
    return %c0_i32, %c0_i32_0 : i32, i32
  }
  func.func @transform_15(%arg0: i32) -> (i32, i32) {
    %c0_i32 = arith.constant 0 : i32
    %c0_i32_0 = arith.constant 0 : i32
    %c0_i32_1 = arith.constant 0 : i32
    return %c0_i32, %c0_i32_0 : i32, i32
  }
  func.func @transform_16(%arg0: i32) -> (i32, i32, i32) {
    %c0_i32 = arith.constant 0 : i32
    %c0_i32_0 = arith.constant 0 : i32
    %c0_i32_1 = arith.constant 0 : i32
    return %arg0, %c0_i32, %c0_i32_0 : i32, i32, i32
  }
  func.func @transform_17(%arg0: i32) -> (i32, i32, i32) {
    %c0_i32 = arith.constant 0 : i32
    %c0_i32_0 = arith.constant 0 : i32
    %c0_i32_1 = arith.constant 0 : i32
    return %arg0, %c0_i32, %c0_i32_0 : i32, i32, i32
  }
  func.func @transform_18(%arg0: i32) -> (i32, i32, i32) {
    %c0_i32 = arith.constant 0 : i32
    %c0_i32_0 = arith.constant 0 : i32
    %c0_i32_1 = arith.constant 0 : i32
    return %arg0, %c0_i32, %c0_i32_0 : i32, i32, i32
  }
  func.func @transform_19(%arg0: i32) -> (i32, i32, i32) {
    %c0_i32 = arith.constant 0 : i32
    %c0_i32_0 = arith.constant 0 : i32
    %c0_i32_1 = arith.constant 0 : i32
    return %arg0, %c0_i32, %c0_i32_0 : i32, i32, i32
  }
  func.func @transform_20(%arg0: i32) -> (i32, i32, i32) {
    %c0_i32 = arith.constant 0 : i32
    %c0_i32_0 = arith.constant 0 : i32
    %c0_i32_1 = arith.constant 0 : i32
    return %arg0, %c0_i32, %c0_i32_0 : i32, i32, i32
  }
  func.func @transform_21(%arg0: i32) -> (i32, i32, i32) {
    %c0_i32 = arith.constant 0 : i32
    %c0_i32_0 = arith.constant 0 : i32
    %c0_i32_1 = arith.constant 0 : i32
    return %arg0, %c0_i32, %c0_i32_0 : i32, i32, i32
  }
  func.func @transform_22(%arg0: i32) -> (i32, i32, i32) {
    %c0_i32 = arith.constant 0 : i32
    %c0_i32_0 = arith.constant 0 : i32
    %c0_i32_1 = arith.constant 0 : i32
    return %arg0, %c0_i32, %c0_i32_0 : i32, i32, i32
  }
  func.func @transform_23(%arg0: i32) -> (i32, i32, i32) {
    %c0_i32 = arith.constant 0 : i32
    %c0_i32_0 = arith.constant 0 : i32
    %c0_i32_1 = arith.constant 0 : i32
    return %arg0, %c0_i32, %c0_i32_0 : i32, i32, i32
  }
  func.func @transform_24(%arg0: i32) -> (i32, i32, i32) {
    %c0_i32 = arith.constant 0 : i32
    %c0_i32_0 = arith.constant 0 : i32
    %c0_i32_1 = arith.constant 0 : i32
    return %arg0, %c0_i32, %c0_i32_0 : i32, i32, i32
  }
  func.func @transform_25(%arg0: i32) -> (i32, i32, i32) {
    %c0_i32 = arith.constant 0 : i32
    %c0_i32_0 = arith.constant 0 : i32
    %c0_i32_1 = arith.constant 0 : i32
    return %arg0, %c0_i32, %c0_i32_0 : i32, i32, i32
  }
  func.func @transform_26(%arg0: i32) -> (i32, i32, i32) {
    %c0_i32 = arith.constant 0 : i32
    %c0_i32_0 = arith.constant 0 : i32
    %c0_i32_1 = arith.constant 0 : i32
    return %arg0, %c0_i32, %c0_i32_0 : i32, i32, i32
  }
  func.func @transform_27(%arg0: i32) -> (i32, i32, i32) {
    %c0_i32 = arith.constant 0 : i32
    %c0_i32_0 = arith.constant 0 : i32
    %c0_i32_1 = arith.constant 0 : i32
    return %arg0, %c0_i32, %c0_i32_0 : i32, i32, i32
  }
}

</mosaic_0001>

<bundles_post_ra>
// kernel: voxgnn_forward.1
= control target key start
LH: loop header
LB: loop body
LE: loop exit
PB: predicated region body
PF: predicated region fallthrough
CT: control target
= control target key end

     0   :  { %s4284_s0 = inlined_call_operand.vmem [shape: f32[16,24], index: 0, kind: input, shape index: {}]   ;;  %s4285_s1 = inlined_call_operand.vmem [shape: f32[16,24], index: 1, kind: input, shape index: {}]   ;;  %s4286_s2 = inlined_call_operand.vmem [shape: f32[16,8], index: 2, kind: input, shape index: {}]   ;;  %s4287_s3 = inlined_call_operand.vmem [shape: f32[24,32], index: 3, kind: input, shape index: {}]   ;;  %s4288_s4 = inlined_call_operand.vmem [shape: f32[1,32], index: 4, kind: input, shape index: {}]   ;;  %s4289_s5 = inlined_call_operand.vmem [shape: f32[24,32], index: 5, kind: input, shape index: {}]   ;;  %s4290_s6 = inlined_call_operand.vmem [shape: f32[1,32], index: 6, kind: input, shape index: {}]   ;;  %s4291_s7 = inlined_call_operand.vmem [shape: f32[8,32], index: 7, kind: input, shape index: {}]   ;;  %s4292_s8 = inlined_call_operand.vmem [shape: f32[1,32], index: 8, kind: input, shape index: {}]   ;;  %s4293_s9 = inlined_call_operand.vmem [shape: f32[1,32], index: 9, kind: input, shape index: {}]   ;;  %s4294_s10 = inlined_call_operand.vmem [shape: f32[1,32], index: 10, kind: input, shape index: {}]   ;;  %s4295_s11 = inlined_call_operand.vmem [shape: f32[32,32], index: 11, kind: input, shape index: {}]   ;;  %s4296_s12 = inlined_call_operand.vmem [shape: f32[1,32], index: 12, kind: input, shape index: {}]   ;;  %s4297_s13 = inlined_call_operand.vmem [shape: f32[32,32], index: 13, kind: input, shape index: {}]   ;;  %s4298_s14 = inlined_call_operand.vmem [shape: f32[1,32], index: 14, kind: input, shape index: {}]   ;;  %s4299_s15 = inlined_call_operand.vmem [shape: f32[1,32], index: 15, kind: input, shape index: {}]   ;;  %s4300_s16 = inlined_call_operand.vmem [shape: f32[3,16,16], index: 16, kind: input, shape index: {}]   ;;  %s4301_s17 = inlined_call_operand.vmem [shape: f32[3,32,32], index: 17, kind: input, shape index: {}]   ;;  %s4302_s18 = inlined_call_operand.vmem [shape: f32[3,32,32], index: 18, kind: input, shape index: {}]   ;;  %s4303_s19 = inlined_call_operand.vmem [shape: f32[3,1,32], index: 19, kind: input, shape index: {}]   ;;  %s4304_s20 = inlined_call_operand.vmem [shape: f32[3,32,32], index: 20, kind: input, shape index: {}]   ;;  %s4305_s21 = inlined_call_operand.vmem [shape: f32[3,1,32], index: 21, kind: input, shape index: {}]   ;;  %s4306_s22 = inlined_call_operand.vmem [shape: f32[3,1,32], index: 22, kind: input, shape index: {}]   ;;  %s4307_s23 = inlined_call_operand.vmem [shape: f32[3,1,32], index: 23, kind: input, shape index: {}]   ;;  %s4308_s24 = inlined_call_operand.vmem [shape: f32[3,32,16], index: 24, kind: input, shape index: {}]   ;;  %s4309_s25 = inlined_call_operand.vmem [shape: f32[3,1,16], index: 25, kind: input, shape index: {}]   ;;  %s4310_s26 = inlined_call_operand.vmem [shape: f32[3,32,16], index: 26, kind: input, shape index: {}]   ;;  %s4311_s27 = inlined_call_operand.vmem [shape: f32[3,16,16], index: 27, kind: output, shape index: {}]  }
   0x1   :  { %4321 = sst [smem:[#allocation2_spill]] %s4284_s0 }
   0x2   :  { %4322 = sst [smem:[#allocation3_spill]] %s4285_s1 }
   0x3   :  { %4323 = sst [smem:[#allocation4_spill]] %s4286_s2 }
   0x4   :  { %4324 = sst [smem:[#allocation5_spill]] %s4287_s3 }
   0x5   :  { %4325 = sst [smem:[#allocation6_spill]] %s4288_s4 }
   0x6   :  { %4326 = sst [smem:[#allocation7_spill]] %s4289_s5 }
   0x7   :  { %4327 = sst [smem:[#allocation8_spill]] %s4290_s6 }
   0x8   :  { %4328 = sst [smem:[#allocation9_spill]] %s4291_s7  ;;  %s3818_s7 = smov 0  }
   0x9   :  { %4329 = sst [smem:[#allocation10_spill]] %s4292_s8 }
   0xa   :  { %4330 = sst [smem:[#allocation11_spill]] %s4293_s9 }
   0xb   :  { %4331 = sst [smem:[#allocation12_spill]] %s4294_s10 }
   0xc   :  { %4332 = sst [smem:[#allocation13_spill]] %s4295_s11 }
   0xd LB: > { %p3305_p0 = scmp.ge.s32.totalorder %s3675_s7, 1  ;;  %p827_p1 = scmp.lt.s32.totalorder %s3675_s7, 4  ;;  %s3675_s7 = sphi %s3818_s7, %s37_s7  }
   0xf   : > { %p828_p2 = pnand %p3305_p0, %p827_p1 }
  0x10   : > { %s4333_s9 = sld [smem:[#allocation5_spill]] (!%p828_p2)  ;;  %s4339_s10 = sadd.s32 (!%p828_p2), 4294967295, %s3675_s7  }
  0x11   : > { %831 = sbr.rel (%p828_p2) target bundleno = 1736 (0x6c8), region = 128  ;;  %s4334_s29 = sld [smem:[#allocation2_spill]] (!%p828_p2) }
  0x12   : > { %s4335_s3 = sld [smem:[#allocation9_spill]] (!%p828_p2)  ;;  %p939_p3 = scmp.lt.s32.totalorder (!%p828_p2), %s4339_s10, 2 }
  0x13   : > { %s4336_s5 = sld [smem:[#allocation4_spill]] (!%p828_p2)  ;;  %s4340_s1 = smov (!%p828_p2), %s4339_s10 }
  0x14   : > { %s4337_s6 = sld [smem:[#allocation7_spill]] (!%p828_p2) }
  0x15   : > { %s4338_s11 = sld [smem:[#allocation3_spill]] (!%p828_p2) }
  0x16   : > { %v993_v0 = vld [vmem:[%s4333_s9 + $0x10] sm:$0xff]  ;;  %v992_v1 = vld [vmem:[%s4333_s9 + $0x8] sm:$0xff]  ;;  %vm1001_vm0 = vcmask 195584   ;;  %v991_v3 = vld [vmem:[%s4333_s9] sm:$0xff]  ;;  %vm1183_vm1 = vcmask 64512   ;;  %s4348_s1 = smov (!%p939_p3, %s4340_s1), 2 }
  0x17   : > { %3489 = vmatprep.subr.mxu0 %v993_v0  ;;  %v989_v2 = vld [vmem:[%s4334_s29] sm:$0xff]  ;;  %v990_v6 = vld [vmem:[%s4334_s29 + $0x8] sm:$0xff]  ;;  %s3878_s2 = sshll.u32 %s4348_s1, 5  ;;  %vm1278_vm2 = vcmask 261120   ;;  %s4344_s0 = sld [smem:[#allocation11_spill]]  ;;  %vm1328_vm3 = vcmask 130048  }
  0x18   : > { %3490 = vmatpush3.msra.mxu0 %v993_v0  ;;  %3495 = vmatprep.mubr.msk.f32.mxu0 %vm1001_vm0, %v989_v2  ;;  %v1182_v4 = vld [vmem:[%s4335_s3] sm:$0xff]  ;;  %s948_s30 = scalar_lea.vmem %s4301_s17, %s3878_s2  ;;  %s3888_s28 = scalar_lea.vmem %s4302_s18, %s3878_s2  ;;  %vm2487_vm4 = vcmask 1041409   ;;  %vm2490_vm5 = vcmask 1042434   ;;  %vm2493_vm6 = vcmask 1043459   ;;  %vm2496_vm7 = vcmask 1044484  }
  0x19   : > { %3491 = vmatprep.subr.mxu0 %v992_v1  ;;  %v1180_v5 = vld [vmem:[%s4336_s5] sm:$0xff]  ;;  %3507 = vmatprep.subr.mxu1 %v1182_v4  ;;  %v1181_v10 = vld [vmem:[%s4336_s5 + $0x8] sm:$0xff]  ;;  %v1524_v13 = vld [vmem:[%s948_s30 + $0x18] sm:$0xff]  ;;  %s4341_s3 = sld [smem:[#allocation6_spill]]  ;;  %s961_s9 = scalar_lea.vmem %s4304_s20, %s3878_s2  ;;  %vm2499_vm8 = vcmask 1045509   ;;  %vm2502_vm9 = vcmask 1046534  }
  0x1a   : > { %3492 = vmatpush3.msra.mxu0 %v992_v1  ;;  %v1087_v7 = vld [vmem:[%s4337_s6 + $0x10] sm:$0xff]  ;;  %3508 = vmatpush3.msra.mxu1 %v1182_v4  ;;  %v1086_v9 = vld [vmem:[%s4337_s6 + $0x8] sm:$0xff]  ;;  %v1085_v11 = vld [vmem:[%s4337_s6] sm:$0xff]  ;;  %s4342_s5 = sld [smem:[#allocation8_spill]]  ;;  %vm2505_vm10 = vcmask 1047559   ;;  %s967_s10 = scalar_lea.vmem %s4306_s22, %s4348_s1 }
  0x1b   : > { %3493 = vmatprep.subr.mxu0 %v991_v3  ;;  %v1083_v8 = vld [vmem:[%s4338_s11] sm:$0xff]  ;;  %3509 = vmatprep.mubr.msk.f32.mxu1 %vm1183_vm1, %v1180_v5  ;;  %v1084_v12 = vld [vmem:[%s4338_s11 + $0x8] sm:$0xff]  ;;  %v1523_v14 = vld [vmem:[%s948_s30 + $0x10] sm:$0xff]  ;;  %s4343_s6 = sld [smem:[#allocation10_spill]] }
  0x1c   : > { %3494 = vmatpush3.msra.mxu0 %v991_v3  ;;  %3510 = vmatmul.mubr.msk.f32.vlgmr.msra.gmra.mxu1 %vm1183_vm1, %v1181_v10  ;;  %v1522_v15 = vld [vmem:[%s948_s30 + $0x8] sm:$0xff]  ;;  %v1521_v16 = vld [vmem:[%s948_s30] sm:$0xff]  ;;  %v1609_v17 = vld [vmem:[%s3888_s28 + $0x18] sm:$0xff]  ;;  %s4345_s8 = sld [smem:[#allocation12_spill]]  ;;  %s970_s30 = scalar_lea.vmem %s4307_s23, %s4348_s1 }
  0x1d   : > { %3496 = vmatmul.mubr.msk.f32.vlgmr.msra.gmra.mxu0 %vm1001_vm0, %v990_v6  ;;  %3498 = vmatprep.subr.mxu0 %v1087_v7  ;;  %v3329_v63 = vld [vmem:[%s4344_s0] ss:$0 sm:$0xff]  ;;  %v1607_v10 = vld [vmem:[%s3888_s28 + $0x8] sm:$0xff] }
  0x1e   : > { %3499 = vmatpush3.msra.mxu0 %v1087_v7  ;;  %3504 = vmatprep.mubr.msk.f32.mxu0 %vm1001_vm0, %v1083_v8 }
  0x1f   : > { %3500 = vmatprep.subr.mxu0 %v1086_v9  ;;  %v3320_v19 = vld [vmem:[%s4341_s3] ss:$0 sm:$0xff]  ;;  %s983_s3 = scalar_lea.vmem %s4310_s26, %s3878_s2 }
  0x20   : > { %3501 = vmatpush3.msra.mxu0 %v1086_v9  ;;  %v3325_v23 = vld [vmem:[%s4342_s5] ss:$0 sm:$0xff]  ;;  %v1608_v9 = vld [vmem:[%s3888_s28 + $0x10] sm:$0xff]  ;;  %s4346_s5 = sld [smem:[#allocation13_spill]] }
  0x21   : > { %3502 = vmatprep.subr.mxu0 %v1085_v11  ;;  %v3328_v30 = vld [vmem:[%s4343_s6] ss:$0 sm:$0xff]  ;;  %s975_s6 = scalar_lea.vmem %s4308_s24, %s3878_s2 }
  0x22   : > { %3503 = vmatpush3.msra.mxu0 %v1085_v11  ;;  %v3330_v2 = vld [vmem:[%s4345_s8] ss:$0 sm:$0xff]  ;;  %s956_s8 = scalar_lea.vmem %s4303_s19, %s4348_s1 }
  0x23   : > { %3505 = vmatmul.mubr.msk.f32.vlgmr.msra.gmra.mxu0 %vm1001_vm0, %v1084_v12  ;;  %3512 = vmatprep.subr.mxu0 %v1524_v13  ;;  %v1606_v11 = vld [vmem:[%s3888_s28] sm:$0xff]  ;;  %v1943_v12 = vld [vmem:[%s961_s9 + $0x18] sm:$0xff]  ;;  %s3389_s28 = sshll.u32 %s4348_s1, 4 }
  0x24   : > { %3513 = vmatpush3.msra.mxu0 %v1524_v13  ;;  %v1942_v13 = vld [vmem:[%s961_s9 + $0x10] sm:$0xff]  ;;  %3534 = vmatprep.subr.mxu1 %v1943_v12  ;;  %s3927_s0 = scalar_lea.vmem %s4300_s16, %s3389_s28 }
  0x25   : > { %3514 = vmatprep.subr.mxu0 %v1523_v14  ;;  %3535 = vmatpush3.msra.mxu1 %v1943_v12 }
  0x26   : > { %3515 = vmatpush3.msra.mxu0 %v1523_v14  ;;  %v1941_v14 = vld [vmem:[%s961_s9 + $0x8] sm:$0xff]  ;;  %3536 = vmatprep.subr.mxu1 %v1942_v13 }
  0x27   : > { %3516 = vmatprep.subr.mxu0 %v1522_v15  ;;  %3537 = vmatpush3.msra.mxu1 %v1942_v13 }
  0x28   : > { %3517 = vmatpush3.msra.mxu0 %v1522_v15  ;;  %v1940_v15 = vld [vmem:[%s961_s9] sm:$0xff]  ;;  %3538 = vmatprep.subr.mxu1 %v1941_v14  ;;  %s964_s9 = scalar_lea.vmem %s4305_s21, %s4348_s1 }
  0x29   : > { %3518 = vmatprep.subr.mxu0 %v1521_v16  ;;  %3539 = vmatpush3.msra.mxu1 %v1941_v14 }
  0x2a   : > { %3519 = vmatpush3.msra.mxu0 %v1521_v16  ;;  %3540 = vmatprep.subr.mxu1 %v1940_v15  ;;  %v1345_v16 = vlaneseq }
  0x2b   : > { %3523 = vmatprep.subr.mxu0 %v1609_v17  ;;  %3541 = vmatpush3.msra.mxu1 %v1940_v15 }
  0xdc   : > { %v3511_v27 = vpop.f32.mrf.mxu1 }
  0xdd   : > { %v3497_v18 = vpop.f32.mrf.mxu0 }
  0xde   : > { %v1080_v21 = vadd.f32 %v3497_v18, %v3320_v19  ;;  %v1256_v33 = vpop.f32.mrf.mxu1  ;;  %v3932_v18 = vshrl.u32 %v1345_v16, 7 }
  0xdf   : > { %v1074_v20 = vpop.f32.mrf.mxu0 }
  0xe0   : > { %v1075_v24 = vadd.f32 %v3320_v19, %v1074_v20 }
  0xe3   : > { %v3506_v22 = vpop.f32.mrf.mxu0 }
  0xe4   : > { %v1170_v25 = vadd.f32 %v3506_v22, %v1080_v21  ;;  %v1358_v21 = vsub.s32 1, %v3932_v18 }
  0xe5   : > { %v1160_v26 = vpop.f32.mrf.mxu0 }
  0xe6   : > { %v1169_v28 = vadd.f32 %v1160_v26, %v1075_v24  ;;  %v1179_v29 = vadd.f32 %v3325_v23, %v1170_v25  ;;  %v3938_v25 = vld [vmem:[%s3927_s0 + $0x8] sm:$0xff] }
  0xe7   : > { %v1342_v26 = vsub.f32 1.0, %v3938_v25 }
  0xe8   : > { %v1266_v31 = vadd.f32 %v3511_v27, %v1179_v29  ;;  %v1178_v32 = vadd.f32 %v3325_v23, %v1169_v28  ;;  %v1369_v23 = vsub.s32 2, %v3932_v18  ;;  %v3942_v28 = vsub.s32 0, %v3932_v18 }
  0xe9   : > { %v1344_v27 = vmul.f32 -1e+30, %v1342_v26 }
  0xea   : > { %v1275_v34 = vadd.f32 %v3328_v30, %v1266_v31  ;;  %v1265_v35 = vadd.f32 %v1256_v33, %v1178_v32  ;;  %v1380_v31 = vsub.s32 3, %v3932_v18 }
  0xeb   : > { %v1458_v29 = vrot.slane %v1344_v27, %v1369_v23  ;;  %v1436_v33 = vrot.slane %v1344_v27, %v3942_v28 }
  0xec   : > { %v1274_v36 = vadd.f32 %v3328_v30, %v1265_v35  ;;  %v1280_v37 = vsel %vm1278_vm2, %v1275_v34, 0.0  ;;  %v1469_v35 = vrot.slane %v1344_v27, %v1380_v31 }
  0xee   : > { %v1279_v38 = vsel %vm1278_vm2, %v1274_v36, 0.0 }
  0xef   : > { %v1281_v39 = vadd.f32 %v1280_v37, %v1279_v38 }
  0xf1   : > { %v1282_v40 = vrot.slane %v1281_v39, 4 }
  0xf3   : > { %v1283_v41 = vadd.f32 %v1282_v40, %v1281_v39  ;;  %v1402_v39 = vsub.s32 5, %v3932_v18 }
  0xf5   : > { %v1284_v42 = vrot.slane %v1283_v41, 2 }
  0xf7   : > { %v1285_v43 = vadd.f32 %v1284_v42, %v1283_v41  ;;  %v1491_v41 = vrot.slane %v1344_v27, %v1402_v39  ;;  %v1413_v42 = vsub.s32 6, %v3932_v18 }
  0xf9   : > { %v1286_v44 = vrot.slane %v1285_v43, 1 }
  0xfb   : > { %v1287_v45 = vadd.f32 %v1286_v44, %v1285_v43  ;;  %v1502_v44 = vrot.slane %v1344_v27, %v1413_v42 }
  0xfd   : > { %v1289_v46 = vmul.f32 0.0625, %v1287_v45  ;;  %v1424_v45 = vsub.s32 7, %v3932_v18 }
  0xff   : > { %v1290_v47 = vsub.f32 %v1274_v36, %v1289_v46  ;;  %v1291_v48 = vsub.f32 %v1275_v34, %v1289_v46  ;;  %v1447_v34 = vrot.slane %v1344_v27, %v1358_v21  ;;  %v1391_v36 = vsub.s32 4, %v3932_v18 }
 0x101   : > { %v1292_v49 = vmul.f32 %v1290_v47, %v1290_v47  ;;  %v1293_v50 = vmul.f32 %v1291_v48, %v1291_v48  ;;  %1449 = vbcast.lane.b32.xlu1 %v1447_v34, 256  ;;  %v1480_v38 = vrot.slane %v1344_v27, %v1391_v36 }
 0x103   : > { %v1294_v51 = vsel %vm1278_vm2, %v1292_v49, 0.0  ;;  %v1295_v52 = vsel %vm1278_vm2, %v1293_v50, 0.0  ;;  %v3677_v49 = vmov 1966171168  }
 0x104   : > { %v1296_v53 = vadd.f32 %v1295_v52, %v1294_v51  ;;  %v1700_v50 = vunpack.c.l.s4 %v3677_v49 }
 0x105   : > { %1453 = vbcast.lane.b32.xlu1 %v1447_v34, 264  ;;  %v1332_v34 = vsel %vm1328_vm3, %v3938_v25, 0.0 }
 0x106   : > { %v1297_v54 = vrot.slane %v1296_v53, 4 }
 0x108   : > { %v1298_v55 = vadd.f32 %v1297_v54, %v1296_v53  ;;  %v1701_v54 = vunpack.c.0.s8 %v1700_v50 }
 0x10a   : > { %v1299_v56 = vrot.slane %v1298_v55, 2 }
 0x10c   : > { %v1300_v57 = vadd.f32 %v1299_v56, %v1298_v55 }
 0x10e   : > { %v1301_v58 = vrot.slane %v1300_v57, 1 }
 0x110   : > { %v1302_v59 = vadd.f32 %v1301_v58, %v1300_v57  ;;  %v3335_v57 = vld [vmem:[%s956_s8] ss:$0 sm:$0xff] }
 0x112   : > { %v1303_v60 = vmul.f32 0.0625, %v1302_v59  ;;  %v3965_v59 = vsub.s32 %v1701_v54, %v3932_v18 }
 0x114   : > { %v1304_v61 = vadd.f32 1e-05, %v1303_v60 }
 0x116   : > { %3657 = vrsqrt.f32 %v1304_v61 }
 0x123   : > { %v3658_v62 = vpop.eup %3657 }
 0x124   : > { %v1306_v0 = vmul.f32 %v3658_v62, %v1290_v47  ;;  %v1307_v1 = vmul.f32 %v3658_v62, %v1291_v48  ;;  %v1513_v47 = vrot.slane %v1344_v27, %v1424_v45 }
 0x126   : > { %v1314_v3 = vmul.f32 %v3329_v63, %v1306_v0  ;;  %v1315_v4 = vmul.f32 %v3329_v63, %v1307_v1 }
 0x128   : > { %v1322_v5 = vadd.f32 %v3330_v2, %v1314_v3  ;;  %v1323_v6 = vadd.f32 %v3330_v2, %v1315_v4 }
 0x12a   : > { %v1324_v7 = vmax.f32 %v1322_v5, 0.0  ;;  %v1325_v8 = vmax.f32 %v1323_v6, 0.0 }
 0x12c   : > { %3520 = vmatprep.mubr.msk.f32.mxu0 %vm1278_vm2, %v1324_v7 }
 0x12d   : > { %3521 = vmatmul.mubr.msk.f32.vlgmr.msra.gmra.mxu0 %vm1278_vm2, %v1325_v8 }
 0x12e   : > { %3524 = vmatpush3.msra.mxu0 %v1609_v17  ;;  %3531 = vmatprep.mubr.msk.f32.mxu0 %vm1278_vm2, %v1324_v7  ;;  %v3930_v17 = vld [vmem:[%s3927_s0] sm:$0xff] }
 0x12f   : > { %3525 = vmatprep.subr.mxu0 %v1608_v9  ;;  %v1341_v19 = vsub.f32 1.0, %v3930_v17  ;;  %v1329_v52 = vsel %vm1328_vm3, %v3930_v17, 0.0 }
 0x130   : > { %3526 = vmatpush3.msra.mxu0 %v1608_v9 }
 0x131   : > { %3527 = vmatprep.subr.mxu0 %v1607_v10  ;;  %v1343_v20 = vmul.f32 -1e+30, %v1341_v19 }
 0x132   : > { %3528 = vmatpush3.msra.mxu0 %v1607_v10 }
 0x133   : > { %3529 = vmatprep.subr.mxu0 %v1606_v11  ;;  %v1359_v22 = vrot.slane %v1343_v20, %v1358_v21  ;;  %v1370_v24 = vrot.slane %v1343_v20, %v1369_v23  ;;  %v1348_v30 = vrot.slane %v1343_v20, %v3942_v28  ;;  %v1381_v32 = vrot.slane %v1343_v20, %v1380_v31 }
 0x134   : > { %3530 = vmatpush3.msra.mxu0 %v1606_v11  ;;  %v1392_v37 = vrot.slane %v1343_v20, %v1391_v36  ;;  %v1403_v40 = vrot.slane %v1343_v20, %v1402_v39  ;;  %v1414_v43 = vrot.slane %v1343_v20, %v1413_v42  ;;  %v1425_v46 = vrot.slane %v1343_v20, %v1424_v45 }
 0x135   : > { %3532 = vmatmul.mubr.msk.f32.vlgmr.msra.gmra.mxu0 %vm1278_vm2, %v1325_v8  ;;  %1361 = vbcast.lane.b32.xlu0 %v1359_v22, 256 }
 0x136   : > { %1376 = vbcast.lane.b32.xlu1 %v1370_v24, 264  ;;  %3594 = vmatprep.mubr.msk.f32.mxu0 %vm1328_vm3, %v3930_v17 }
 0x139   : > { %1365 = vbcast.lane.b32.xlu0 %v1359_v22, 264 }
 0x13a   : > { %1464 = vbcast.lane.b32.xlu1 %v1458_v29, 264 }
 0x13d   : > { %1372 = vbcast.lane.b32.xlu0 %v1370_v24, 256 }
 0x13e   : > { %1354 = vbcast.lane.b32.xlu1 %v1348_v30, 264 }
 0x141   : > { %1460 = vbcast.lane.b32.xlu0 %v1458_v29, 256 }
 0x142   : > { %1387 = vbcast.lane.b32.xlu1 %v1381_v32, 264 }
 0x145   : > { %1350 = vbcast.lane.b32.xlu0 %v1348_v30, 256 }
 0x146   : > { %1442 = vbcast.lane.b32.xlu1 %v1436_v33, 264 }
 0x149   : > { %1383 = vbcast.lane.b32.xlu0 %v1381_v32, 256 }
 0x14a   : > { %1475 = vbcast.lane.b32.xlu1 %v1469_v35, 264 }
 0x14d   : > { %1438 = vbcast.lane.b32.xlu0 %v1436_v33, 256 }
 0x14e   : > { %1398 = vbcast.lane.b32.xlu1 %v1392_v37, 264 }
 0x151   : > { %1471 = vbcast.lane.b32.xlu0 %v1469_v35, 256 }
 0x152   : > { %1486 = vbcast.lane.b32.xlu1 %v1480_v38, 264 }
 0x155   : > { %1394 = vbcast.lane.b32.xlu0 %v1392_v37, 256 }
 0x156   : > { %1409 = vbcast.lane.b32.xlu1 %v1403_v40, 264 }
 0x159   : > { %1482 = vbcast.lane.b32.xlu0 %v1480_v38, 256 }
 0x15a   : > { %1497 = vbcast.lane.b32.xlu1 %v1491_v41, 264 }
 0x15d   : > { %1405 = vbcast.lane.b32.xlu0 %v1403_v40, 256 }
 0x15e   : > { %1420 = vbcast.lane.b32.xlu1 %v1414_v43, 264 }
 0x161   : > { %1493 = vbcast.lane.b32.xlu0 %v1491_v41, 256 }
 0x162   : > { %1508 = vbcast.lane.b32.xlu1 %v1502_v44, 264 }
 0x165   : > { %1416 = vbcast.lane.b32.xlu0 %v1414_v43, 256 }
 0x166   : > { %1431 = vbcast.lane.b32.xlu1 %v1425_v46, 264 }
 0x169   : > { %1504 = vbcast.lane.b32.xlu0 %v1502_v44, 256 }
 0x16a   : > { %1519 = vbcast.lane.b32.xlu1 %v1513_v47, 264 }
 0x16d   : > { %1427 = vbcast.lane.b32.xlu0 %v1425_v46, 256 }
 0x171   : > { %1515 = vbcast.lane.b32.xlu0 %v1513_v47, 256 }
 0x18e   : > { %1333 = vadd.xlane.f32.xlu1 %v1332_v34 }
 0x190   : > { %1330 = vadd.xlane.f32.xlu0 %v1329_v52 }
 0x1ed   : > { %v3522_v48 = vpop.f32.mrf.mxu0 }
 0x1ef   : > { %v1597_v51 = vpop.f32.mrf.mxu0 }
 0x1f5   : > { %v3955_v53 = vpop.f32.mrf.mxu0 }
 0x1f6   : > { %v1686_v20 = vsub.f32 %v3522_v48, %v3955_v53 }
 0x1f7   : > { %v3961_v55 = vpop.f32.mrf.mxu0 }
 0x1f8   : > { %v1685_v56 = vsub.f32 %v1597_v51, %v3961_v55  ;;  %v1695_v29 = vadd.f32 %v3335_v57, %v1686_v20 }
 0x1fa   : > { %v1694_v58 = vadd.f32 %v3335_v57, %v1685_v56  ;;  %v1754_v37 = vrot.slane %v1695_v29, %v3965_v59 }
 0x1fc   : > { %v1705_v60 = vrot.slane %v1694_v58, %v3965_v59  ;;  %v1698_v61 = vcombine.high %v1694_v58, %v1694_v58  ;;  %v1770_v43 = vrot.slane %v1754_v37, %v3965_v59  ;;  %v1762_v47 = vcombine.high %v1754_v37, %v1754_v37 }
 0x1fd   : > { %v1747_v58 = vcombine.high %v1695_v29, %v1695_v29 }
 0x1fe   : > { %v1721_v62 = vrot.slane %v1705_v60, %v3965_v59  ;;  %v1713_v63 = vcombine.high %v1705_v60, %v1705_v60  ;;  %v1712_v3 = vrot.slane %v1698_v61, %v3965_v59  ;;  %v1831_v52 = vrot.slane %v1770_v43, %v3942_v28 }
 0x1ff   : > { %v1784_v54 = vrot.slane %v1762_v47, %v3965_v59 }
 0x200   : > { %v1799_v0 = vrot.slane %v1721_v62, %v3942_v28  ;;  %v1735_v1 = vrot.slane %v1713_v63, %v3965_v59  ;;  %v1743_v2 = vcombine.high %v1721_v62, %v1721_v62  ;;  %v1728_v13 = vrot.slane %v1712_v3, %v3965_v59 }
 0x201   : > { %v1714_v17 = vcombine.high %v1712_v3, %v1712_v3  ;;  %v1892_v61 = vadd.f32 %v1831_v52, %v3961_v55  ;;  %v1835_v62 = vrot.slane %v1784_v54, %v3942_v28  ;;  %v1792_v63 = vcombine.high %v1770_v43, %v1770_v43 }
 0x202   : > { %v1876_v4 = vadd.f32 %v1799_v0, %v3961_v55  ;;  %v1877_v5 = vadd.f32 %v3955_v53, %v1799_v0  ;;  %v1803_v6 = vrot.slane %v1735_v1, %v3942_v28  ;;  %v1807_v7 = vrot.slane %v1743_v2, %v3942_v28 }
 0x203   : > { %v1745_v8 = vcombine.high %v1735_v1, %v1735_v1  ;;  %v1815_v23 = vrot.slane %v1728_v13, %v3942_v28  ;;  %v1742_v24 = vrot.slane %v1714_v17, %v3965_v59  ;;  %v1744_v33 = vcombine.high %v1728_v13, %v1728_v13 }
 0x204   : > { %v1908_v9 = vmax.f32 %v1876_v4, 0.0  ;;  %v1909_v10 = vmax.f32 %v1877_v5, 0.0  ;;  %v1878_v11 = vadd.f32 %v1803_v6, %v3961_v55  ;;  %v1879_v12 = vadd.f32 %v3955_v53, %v1803_v6 }
 0x205   : > { %v1880_v15 = vadd.f32 %v1807_v7, %v3961_v55  ;;  %v1811_v16 = vrot.slane %v1745_v8, %v3942_v28  ;;  %v1881_v19 = vadd.f32 %v3955_v53, %v1807_v7  ;;  %v1884_v31 = vadd.f32 %v1815_v23, %v3961_v55 }
 0x206   : > { %3542 = vmatprep.mubr.msk.f32.mxu1 %vm1278_vm2, %v1908_v9  ;;  %v1910_v14 = vmax.f32 %v1878_v11, 0.0  ;;  %v1911_v18 = vmax.f32 %v1879_v12, 0.0  ;;  %v1819_v32 = vrot.slane %v1742_v24, %v3942_v28  ;;  %v1885_v36 = vadd.f32 %v3955_v53, %v1815_v23 }
 0x207   : > { %3543 = vmatmul.mubr.msk.f32.vlgmr.msra.gmra.mxu1 %vm1278_vm2, %v1909_v10  ;;  %v1912_v21 = vmax.f32 %v1880_v15, 0.0  ;;  %v1882_v22 = vadd.f32 %v1811_v16, %v3961_v55  ;;  %v1913_v26 = vmax.f32 %v1881_v19, 0.0  ;;  %v1883_v27 = vadd.f32 %v3955_v53, %v1811_v16 }
 0x208   : > { %3545 = vmatprep.mubr.msk.f32.mxu1 %vm1278_vm2, %v1910_v14  ;;  %v1916_v38 = vmax.f32 %v1884_v31, 0.0  ;;  %v1886_v39 = vadd.f32 %v1819_v32, %v3961_v55  ;;  %v1823_v40 = vrot.slane %v1744_v33, %v3942_v28  ;;  %v1746_v41 = vcombine.high %v1742_v24, %v1742_v24 }
 0x209   : > { %v1914_v30 = vmax.f32 %v1882_v22, 0.0  ;;  %v1915_v35 = vmax.f32 %v1883_v27, 0.0  ;;  %v1917_v42 = vmax.f32 %v1885_v36, 0.0  ;;  %v1887_v25 = vadd.f32 %v3955_v53, %v1819_v32 }
 0x20a   : > { %v1918_v44 = vmax.f32 %v1886_v39, 0.0  ;;  %v1888_v45 = vadd.f32 %v1823_v40, %v3961_v55  ;;  %v1827_v46 = vrot.slane %v1746_v41, %v3942_v28  ;;  %v1889_v49 = vadd.f32 %v3955_v53, %v1823_v40 }
 0x20b   : > { %3546 = vmatmul.mubr.msk.f32.gmra.mxu1 %vm1278_vm2, %v1911_v18  ;;  %v1919_v48 = vmax.f32 %v1887_v25, 0.0  ;;  %v1893_v1 = vadd.f32 %v3955_v53, %v1831_v52  ;;  %v1761_v2 = vrot.slane %v1747_v58, %v3965_v59  ;;  %v1924_v3 = vmax.f32 %v1892_v61, 0.0 }
 0x20c   : > { %3548 = vmatprep.mubr.msk.f32.mxu1 %vm1278_vm2, %v1912_v21  ;;  %v1920_v50 = vmax.f32 %v1888_v45, 0.0  ;;  %v1890_v51 = vadd.f32 %v1827_v46, %v3961_v55  ;;  %v1921_v56 = vmax.f32 %v1889_v49, 0.0  ;;  %v1891_v57 = vadd.f32 %v3955_v53, %v1827_v46  ;;  %v4062_v45 = vpop.permute.xlu1 %1449 }
 0x20d   : > { %v1894_v4 = vadd.f32 %v1835_v62, %v3961_v55  ;;  %v1839_v5 = vrot.slane %v1792_v63, %v3942_v28  ;;  %v1794_v6 = vcombine.high %v1784_v54, %v1784_v54  ;;  %v1925_v7 = vmax.f32 %v1893_v1, 0.0 }
 0x20e   : > { %v1922_v60 = vmax.f32 %v1890_v51, 0.0  ;;  %v1923_v0 = vmax.f32 %v1891_v57, 0.0  ;;  %v1895_v8 = vadd.f32 %v3955_v53, %v1835_v62  ;;  %v1777_v9 = vrot.slane %v1761_v2, %v3965_v59 }
 0x20f   : > { %3549 = vmatmul.mubr.msk.f32.gmra.mxu1 %vm1278_vm2, %v1913_v26  ;;  %v1926_v10 = vmax.f32 %v1894_v4, 0.0  ;;  %v1896_v11 = vadd.f32 %v1839_v5, %v3961_v55  ;;  %v1843_v12 = vrot.slane %v1794_v6, %v3942_v28  ;;  %v1763_v13 = vcombine.high %v1761_v2, %v1761_v2 }
 0x210   : > { %3551 = vmatprep.mubr.msk.f32.mxu1 %vm1278_vm2, %v1914_v30  ;;  %v1927_v14 = vmax.f32 %v1895_v8, 0.0  ;;  %v1897_v15 = vadd.f32 %v3955_v53, %v1839_v5  ;;  %v1847_v18 = vrot.slane %v1777_v9, %v3942_v28  ;;  %v1793_v26 = vcombine.high %v1777_v9, %v1777_v9 }
 0x211   : > { %v1928_v16 = vmax.f32 %v1896_v11, 0.0  ;;  %v1898_v17 = vadd.f32 %v1843_v12, %v3961_v55  ;;  %v1791_v19 = vrot.slane %v1763_v13, %v3965_v59  ;;  %v1899_v21 = vadd.f32 %v3955_v53, %v1843_v12 }
 0x212   : > { %v1929_v20 = vmax.f32 %v1897_v15, 0.0  ;;  %v1900_v23 = vadd.f32 %v1847_v18, %v3961_v55  ;;  %v1901_v59 = vadd.f32 %v3955_v53, %v1847_v18  ;;  %v1855_v31 = vrot.slane %v1793_v26, %v3942_v28 }
 0x213   : > { %3552 = vmatmul.mubr.msk.f32.gmra.mxu1 %vm1278_vm2, %v1915_v35  ;;  %v1930_v22 = vmax.f32 %v1898_v17, 0.0  ;;  %v1851_v24 = vrot.slane %v1791_v19, %v3942_v28  ;;  %v1931_v27 = vmax.f32 %v1899_v21, 0.0  ;;  %v1795_v32 = vcombine.high %v1791_v19, %v1791_v19 }
 0x214   : > { %3554 = vmatprep.mubr.msk.f32.mxu1 %vm1278_vm2, %v1916_v38  ;;  %v1932_v29 = vmax.f32 %v1900_v23, 0.0  ;;  %v1933_v33 = vmax.f32 %v1901_v59, 0.0  ;;  %v1904_v36 = vadd.f32 %v1855_v31, %v3961_v55  ;;  %v1905_v39 = vadd.f32 %v3955_v53, %v1855_v31 }
 0x215   : > { %v1902_v30 = vadd.f32 %v1851_v24, %v3961_v55  ;;  %v1903_v34 = vadd.f32 %v3955_v53, %v1851_v24  ;;  %v1859_v37 = vrot.slane %v1795_v32, %v3942_v28 }
 0x216   : > { %v1936_v40 = vmax.f32 %v1904_v36, 0.0 }
 0x217   : > { %3555 = vmatmul.mubr.msk.f32.gmra.mxu1 %vm1278_vm2, %v1917_v42  ;;  %v1934_v35 = vmax.f32 %v1902_v30, 0.0  ;;  %v1935_v38 = vmax.f32 %v1903_v34, 0.0  ;;  %v1906_v41 = vadd.f32 %v1859_v37, %v3961_v55  ;;  %v1937_v42 = vmax.f32 %v1905_v39, 0.0  ;;  %v4064_v55 = vpop.permute.xlu1 %1453 }
 0x218   : > { %3557 = vmatprep.mubr.msk.f32.mxu1 %vm1278_vm2, %v1918_v44  ;;  %v1907_v25 = vadd.f32 %v3955_v53, %v1859_v37  ;;  %v1362_v44 = vpop.permute.xlu0 %1361 }
 0x219   : > { %v1938_v43 = vmax.f32 %v1906_v41, 0.0 }
 0x21a   : > { %v1939_v28 = vmax.f32 %v1907_v25, 0.0 }
 0x21b   : > { %3558 = vmatmul.mubr.msk.f32.gmra.mxu1 %vm1278_vm2, %v1919_v48  ;;  %v1377_v48 = vpop.permute.xlu1 %1376 }
 0x21c   : > { %3560 = vmatprep.mubr.msk.f32.mxu1 %vm1278_vm2, %v1920_v50  ;;  %v1366_v46 = vpop.permute.xlu0 %1365 }
 0x21f   : > { %3561 = vmatmul.mubr.msk.f32.gmra.mxu1 %vm1278_vm2, %v1921_v56  ;;  %v4068_v50 = vpop.permute.xlu1 %1464 }
 0x220   : > { %3563 = vmatprep.mubr.msk.f32.mxu1 %vm1278_vm2, %v1922_v60  ;;  %v1373_v47 = vpop.permute.xlu0 %1372 }
 0x223   : > { %3564 = vmatmul.mubr.msk.f32.gmra.mxu1 %vm1278_vm2, %v1923_v0  ;;  %v1355_v51 = vpop.permute.xlu1 %1354 }
 0x224   : > { %3566 = vmatprep.mubr.msk.f32.mxu1 %vm1278_vm2, %v1924_v3  ;;  %v4066_v49 = vpop.permute.xlu0 %1460 }
 0x227   : > { %3567 = vmatmul.mubr.msk.f32.gmra.mxu1 %vm1278_vm2, %v1925_v7  ;;  %v1388_v54 = vpop.permute.xlu1 %1387 }
 0x228   : > { %3569 = vmatprep.mubr.msk.f32.mxu1 %vm1278_vm2, %v1926_v10  ;;  %v1351_v53 = vpop.permute.xlu0 %1350 }
 0x22b   : > { %3570 = vmatmul.mubr.msk.f32.gmra.mxu1 %vm1278_vm2, %v1927_v14  ;;  %v4072_v57 = vpop.permute.xlu1 %1442 }
 0x22c   : > { %3572 = vmatprep.mubr.msk.f32.mxu1 %vm1278_vm2, %v1928_v16  ;;  %v1384_v52 = vpop.permute.xlu0 %1383 }
 0x22f   : > { %3573 = vmatmul.mubr.msk.f32.gmra.mxu1 %vm1278_vm2, %v1929_v20  ;;  %v4076_v60 = vpop.permute.xlu1 %1475 }
 0x230   : > { %3575 = vmatprep.mubr.msk.f32.mxu1 %vm1278_vm2, %v1930_v22  ;;  %v4070_v56 = vpop.permute.xlu0 %1438 }
 0x233   : > { %3576 = vmatmul.mubr.msk.f32.gmra.mxu1 %vm1278_vm2, %v1931_v27  ;;  %v1399_v63 = vpop.permute.xlu1 %1398 }
 0x234   : > { %3578 = vmatprep.mubr.msk.f32.mxu1 %vm1278_vm2, %v1932_v29  ;;  %v4074_v58 = vpop.permute.xlu0 %1471 }
 0x237   : > { %3579 = vmatmul.mubr.msk.f32.gmra.mxu1 %vm1278_vm2, %v1933_v33  ;;  %v4080_v4 = vpop.permute.xlu1 %1486 }
 0x238   : > { %3581 = vmatprep.mubr.msk.f32.mxu1 %vm1278_vm2, %v1934_v35  ;;  %v1395_v61 = vpop.permute.xlu0 %1394 }
 0x23b   : > { %3582 = vmatmul.mubr.msk.f32.gmra.mxu1 %vm1278_vm2, %v1935_v38  ;;  %v1410_v15 = vpop.permute.xlu1 %1409 }
 0x23c   : > { %3584 = vmatprep.mubr.msk.f32.mxu1 %vm1278_vm2, %v1936_v40  ;;  %v4078_v2 = vpop.permute.xlu0 %1482 }
 0x23f   : > { %3585 = vmatmul.mubr.msk.f32.gmra.mxu1 %vm1278_vm2, %v1937_v42  ;;  %v4088_v59 = vpop.permute.xlu1 %1497 }
 0x240   : > { %3587 = vmatprep.mubr.msk.f32.mxu1 %vm1278_vm2, %v1938_v43  ;;  %v1406_v11 = vpop.permute.xlu0 %1405 }
 0x243   : > { %3588 = vmatmul.mubr.msk.f32.gmra.mxu1 %vm1278_vm2, %v1939_v28  ;;  %v1421_v39 = vpop.permute.xlu1 %1420 }
 0x244   : > { %v4086_v23 = vpop.permute.xlu0 %1493 }
 0x248   : > { %v1417_v36 = vpop.permute.xlu0 %1416 }
 0x2c7   : > { %v3544_v62 = vpop.f32.mrf.mxu1 }
 0x2c8   : > { %v2266_v13 = vadd.f32 %v3544_v62, %v1355_v51 }
 0x2c9   : > { %v2106_v0 = vpop.f32.mrf.mxu1 }
 0x2ca   : > { %v2265_v9 = vadd.f32 %v2106_v0, %v1351_v53  ;;  %v2298_v21 = vsel %vm1278_vm2, %v2266_v13, -inf  ;;  %v4094_v53 = vpop.permute.xlu0 %1504 }
 0x2cb   : > { %v3547_v1 = vpop.f32.mrf.mxu1 }
 0x2cc   : > { %v2268_v7 = vadd.f32 %v3547_v1, %v1366_v46  ;;  %v2297_v18 = vsel %vm1278_vm2, %v2265_v9, -inf }
 0x2cd   : > { %v2116_v3 = vpop.f32.mrf.mxu1  ;;  %v2299_v24 = vmax.f32 %v2297_v18, %v2298_v21 }
 0x2ce   : > { %v2267_v5 = vadd.f32 %v2116_v3, %v1362_v44  ;;  %v2307_v14 = vsel %vm1278_vm2, %v2268_v7, -inf }
 0x2cf   : > { %v3550_v6 = vpop.f32.mrf.mxu1  ;;  %v2300_v32 = vrot.slane %v2299_v24, 4 }
 0x2d0   : > { %v2306_v10 = vsel %vm1278_vm2, %v2267_v5, -inf  ;;  %v2270_v22 = vadd.f32 %v3550_v6, %v1377_v48  ;;  %v4098_v5 = vpop.permute.xlu1 %1508 }
 0x2d1   : > { %v2126_v8 = vpop.f32.mrf.mxu1  ;;  %v2308_v16 = vmax.f32 %v2306_v10, %v2307_v14  ;;  %v2301_v41 = vmax.f32 %v2299_v24, %v2300_v32 }
 0x2d2   : > { %v2269_v19 = vadd.f32 %v2126_v8, %v1373_v47  ;;  %v2316_v31 = vsel %vm1278_vm2, %v2270_v22, -inf }
 0x2d3   : > { %v3553_v12 = vpop.f32.mrf.mxu1  ;;  %v2309_v26 = vrot.slane %v2308_v16, 4  ;;  %v2302_v51 = vrot.slane %v2301_v41, 2 }
 0x2d4   : > { %v2315_v29 = vsel %vm1278_vm2, %v2269_v19, -inf  ;;  %v2272_v43 = vadd.f32 %v3553_v12, %v1388_v54  ;;  %v1432_v21 = vpop.permute.xlu1 %1431 }
 0x2d5   : > { %v2136_v17 = vpop.f32.mrf.mxu1  ;;  %v2310_v33 = vmax.f32 %v2308_v16, %v2309_v26  ;;  %v2317_v34 = vmax.f32 %v2315_v29, %v2316_v31  ;;  %v2303_v8 = vmax.f32 %v2301_v41, %v2302_v51 }
 0x2d6   : > { %v2271_v37 = vadd.f32 %v2136_v17, %v1384_v52  ;;  %v2325_v52 = vsel %vm1278_vm2, %v2272_v43, -inf  ;;  %v1428_v17 = vpop.permute.xlu0 %1427 }
 0x2d7   : > { %v3556_v20 = vpop.f32.mrf.mxu1  ;;  %v2311_v42 = vrot.slane %v2310_v33, 2  ;;  %v2318_v25 = vrot.slane %v2317_v34, 4  ;;  %v2304_v26 = vrot.slane %v2303_v8, 1 }
 0x2d8   : > { %v2274_v44 = vadd.f32 %v3556_v20, %v1399_v63  ;;  %v2324_v46 = vsel %vm1278_vm2, %v2271_v37, -inf }
 0x2d9   : > { %v2146_v27 = vpop.f32.mrf.mxu1  ;;  %v2312_v62 = vmax.f32 %v2310_v33, %v2311_v42  ;;  %v2319_v0 = vmax.f32 %v2317_v34, %v2318_v25 }
 0x2da   : > { %v2273_v40 = vadd.f32 %v2146_v27, %v1395_v61  ;;  %v2326_v61 = vmax.f32 %v2324_v46, %v2325_v52  ;;  %v2334_v3 = vsel %vm1278_vm2, %v2274_v44, -inf }
 0x2db   : > { %v3559_v30 = vpop.f32.mrf.mxu1  ;;  %v2313_v9 = vrot.slane %v2312_v62, 1  ;;  %v2320_v10 = vrot.slane %v2319_v0, 2 }
 0x2dc   : > { %v2333_v48 = vsel %vm1278_vm2, %v2273_v40, -inf  ;;  %v2327_v13 = vrot.slane %v2326_v61, 4  ;;  %v2276_v14 = vadd.f32 %v3559_v30, %v1410_v15 }
 0x2dd   : > { %v2156_v35 = vpop.f32.mrf.mxu1  ;;  %v2335_v54 = vmax.f32 %v2333_v48, %v2334_v3  ;;  %v2314_v27 = vmax.f32 %v2312_v62, %v2313_v9  ;;  %v2321_v29 = vmax.f32 %v2319_v0, %v2320_v10  ;;  %v2305_v62 = vmax.f32 %v2303_v8, %v2304_v26 }
 0x2de   : > { %v2275_v6 = vadd.f32 %v2156_v35, %v1406_v11  ;;  %v2328_v31 = vmax.f32 %v2326_v61, %v2327_v13  ;;  %v2343_v32 = vsel %vm1278_vm2, %v2276_v14, -inf }
 0x2df   : > { %v3562_v38 = vpop.f32.mrf.mxu1  ;;  %v2336_v18 = vrot.slane %v2335_v54, 4 }
 0x2e0   : > { %v2278_v16 = vadd.f32 %v3562_v38, %v1421_v39  ;;  %v2342_v22 = vsel %vm1278_vm2, %v2275_v6, -inf  ;;  %v4111_v39 = vld [vmem:[%s964_s9] ss:$0 sm:$0xff] }
 0x2e1   : > { %v2166_v28 = vpop.f32.mrf.mxu1  ;;  %v2337_v35 = vmax.f32 %v2335_v54, %v2336_v18  ;;  %v2449_v43 = vadd.f32 %v4111_v39, %v2314_v27 }
 0x2e2   : > { %v2277_v7 = vadd.f32 %v2166_v28, %v1417_v36  ;;  %v2352_v33 = vsel %vm1278_vm2, %v2278_v16, -inf  ;;  %v2344_v36 = vmax.f32 %v2342_v22, %v2343_v32 }
 0x2e3   : > { %v3565_v47 = vpop.f32.mrf.mxu1  ;;  %v2338_v0 = vrot.slane %v2337_v35, 2 }
 0x2e4   : > { %v2351_v24 = vsel %vm1278_vm2, %v2277_v7, -inf  ;;  %v2280_v15 = vadd.f32 %v3565_v47, %v1432_v21  ;;  %v2329_v47 = vrot.slane %v2328_v31, 2  ;;  %v2345_v52 = vrot.slane %v2344_v36, 4 }
 0x2e5   : > { %v2176_v1 = vpop.f32.mrf.mxu1  ;;  %v2353_v37 = vmax.f32 %v2351_v24, %v2352_v33  ;;  %v2486_v7 = vrot.slane %v2449_v43, 7  ;;  %v2339_v14 = vmax.f32 %v2337_v35, %v2338_v0  ;;  %v2448_v24 = vadd.f32 %v4111_v39, %v2305_v62 }
 0x2e6   : > { %v2279_v19 = vadd.f32 %v2176_v1, %v1428_v17  ;;  %v2361_v28 = vsel %vm1278_vm2, %v2280_v15, -inf  ;;  %v2346_v16 = vmax.f32 %v2344_v36, %v2345_v52 }
 0x2e7   : > { %v3568_v63 = vpop.f32.mrf.mxu1  ;;  %v2354_v1 = vrot.slane %v2353_v37, 4  ;;  %v4136_v35 = vsel %vm2487_vm4, %v2486_v7, %v2448_v24  ;;  %v2340_v36 = vrot.slane %v2339_v14, 1 }
 0x2e8   : > { %v2282_v51 = vadd.f32 %v3568_v63, %v4072_v57  ;;  %v2330_v63 = vmax.f32 %v2328_v31, %v2329_v47  ;;  %v2347_v32 = vrot.slane %v2346_v16, 2 }
 0x2e9   : > { %v2186_v12 = vpop.f32.mrf.mxu1  ;;  %v2341_v0 = vmax.f32 %v2339_v14, %v2340_v36 }
 0x2ea   : > { %v2281_v40 = vadd.f32 %v2186_v12, %v4070_v56  ;;  %v2370_v8 = vsel %vm1278_vm2, %v2282_v51, -inf }
 0x2eb   : > { %v3571_v20 = vpop.f32.mrf.mxu1 }
 0x2ec   : > { %v2284_v11 = vadd.f32 %v3571_v20, %v4064_v55  ;;  %v2360_v55 = vsel %vm1278_vm2, %v2279_v19, -inf  ;;  %v2355_v20 = vmax.f32 %v2353_v37, %v2354_v1 }
 0x2ed   : > { %v2196_v30 = vpop.f32.mrf.mxu1  ;;  %v2362_v48 = vmax.f32 %v2360_v55, %v2361_v28 }
 0x2ee   : > { %v2283_v34 = vadd.f32 %v2196_v30, %v4062_v45  ;;  %v2379_v41 = vsel %vm1278_vm2, %v2284_v11, -inf  ;;  %v2322_v45 = vrot.slane %v2321_v29, 1  ;;  %v2356_v37 = vrot.slane %v2355_v20, 2 }
 0x2ef   : > { %v3574_v38 = vpop.f32.mrf.mxu1 }
 0x2f0   : > { %v2378_v42 = vsel %vm1278_vm2, %v2283_v34, -inf  ;;  %v2286_v25 = vadd.f32 %v3574_v38, %v4068_v50  ;;  %v2369_v50 = vsel %vm1278_vm2, %v2281_v40, -inf  ;;  %v2323_v9 = vmax.f32 %v2321_v29, %v2322_v45 }
 0x2f1   : > { %v2380_v44 = vmax.f32 %v2378_v42, %v2379_v41  ;;  %v2206_v46 = vpop.f32.mrf.mxu1  ;;  %v2371_v17 = vmax.f32 %v2369_v50, %v2370_v8  ;;  %v2331_v29 = vrot.slane %v2330_v63, 1 }
 0x2f2   : > { %v2285_v56 = vadd.f32 %v2206_v46, %v4066_v49  ;;  %v2388_v3 = vsel %vm1278_vm2, %v2286_v25, -inf  ;;  %v2363_v49 = vrot.slane %v2362_v48, 4  ;;  %v4132_v11 = vadd.f32 %v4111_v39, %v2323_v9 }
 0x2f3   : > { %v3577_v61 = vpop.f32.mrf.mxu1  ;;  %v2381_v10 = vrot.slane %v2380_v44, 4  ;;  %v2372_v33 = vrot.slane %v2371_v17, 4  ;;  %v2348_v46 = vmax.f32 %v2346_v16, %v2347_v32  ;;  %v2332_v62 = vmax.f32 %v2330_v63, %v2331_v29 }
 0x2f4   : > { %v2387_v54 = vsel %vm1278_vm2, %v2285_v56, -inf  ;;  %v2288_v6 = vadd.f32 %v3577_v61, %v4076_v60  ;;  %v2364_v15 = vmax.f32 %v2362_v48, %v2363_v49  ;;  %v2357_v61 = vmax.f32 %v2355_v20, %v2356_v37 }
 0x2f5   : > { %v2389_v12 = vmax.f32 %v2387_v54, %v2388_v3  ;;  %v2216_v57 = vpop.f32.mrf.mxu1  ;;  %v2382_v26 = vmax.f32 %v2380_v44, %v2381_v10  ;;  %v2373_v47 = vmax.f32 %v2371_v17, %v2372_v33  ;;  %v2349_v10 = vrot.slane %v2348_v46, 1 }
 0x2f6   : > { %v2287_v13 = vadd.f32 %v2216_v57, %v4074_v58  ;;  %v2397_v21 = vsel %vm1278_vm2, %v2288_v6, -inf  ;;  %v2365_v45 = vrot.slane %v2364_v15, 2  ;;  %v2358_v17 = vrot.slane %v2357_v61, 1 }
 0x2f7   : > { %v2390_v18 = vrot.slane %v2389_v12, 4  ;;  %v3580_v19 = vpop.f32.mrf.mxu1  ;;  %v2383_v40 = vrot.slane %v2382_v26, 2  ;;  %v2374_v57 = vrot.slane %v2373_v47, 2 }
 0x2f8   : > { %v2396_v60 = vsel %vm1278_vm2, %v2287_v13, -inf  ;;  %v2290_v22 = vadd.f32 %v3580_v19, %v4080_v4  ;;  %v2366_v6 = vmax.f32 %v2364_v15, %v2365_v45 }
 0x2f9   : > { %v2398_v27 = vmax.f32 %v2396_v60, %v2397_v21  ;;  %v2226_v58 = vpop.f32.mrf.mxu1  ;;  %v2391_v30 = vmax.f32 %v2389_v12, %v2390_v18  ;;  %v1520_v12 = vpop.permute.xlu1 %1519 }
 0x2fa   : > { %v2289_v31 = vadd.f32 %v2226_v58, %v4078_v2  ;;  %v2406_v55 = vsel %vm1278_vm2, %v2290_v22, -inf  ;;  %v2489_v2 = vrot.slane %v4132_v11, 6  ;;  %v1516_v18 = vpop.permute.xlu0 %1515  ;;  %v2375_v58 = vmax.f32 %v2373_v47, %v2374_v57 }
 0x2fb   : > { %v2399_v34 = vrot.slane %v2398_v27, 4  ;;  %v3583_v4 = vpop.f32.mrf.mxu1  ;;  %v2392_v28 = vrot.slane %v2391_v30, 2 }
 0x2fc   : > { %v2405_v38 = vsel %vm1278_vm2, %v2289_v31, -inf  ;;  %v2292_v25 = vadd.f32 %v3583_v4, %v4088_v59  ;;  %v2384_v59 = vmax.f32 %v2382_v26, %v2383_v40 }
 0x2fd   : > { %v2400_v41 = vmax.f32 %v2398_v27, %v2399_v34  ;;  %v2407_v42 = vmax.f32 %v2405_v38, %v2406_v55  ;;  %v2236_v43 = vpop.f32.mrf.mxu1  ;;  %v2393_v7 = vmax.f32 %v2391_v30, %v2392_v28  ;;  %v2350_v27 = vmax.f32 %v2348_v46, %v2349_v10 }
 0x2fe   : > { %v2291_v44 = vadd.f32 %v2236_v43, %v4086_v23  ;;  %v2415_v3 = vsel %vm1278_vm2, %v2292_v25, -inf  ;;  %v2385_v19 = vrot.slane %v2384_v59, 1  ;;  %v2451_v34 = vadd.f32 %v4111_v39, %v2332_v62 }
 0x2ff   : > { %v2401_v48 = vrot.slane %v2400_v41, 2  ;;  %v2408_v51 = vrot.slane %v2407_v42, 4  ;;  %v3586_v56 = vpop.f32.mrf.mxu1  ;;  %v2394_v22 = vrot.slane %v2393_v7, 1  ;;  %v2359_v55 = vmax.f32 %v2357_v61, %v2358_v17 }
 0x300   : > { %v2414_v52 = vsel %vm1278_vm2, %v2291_v44, -inf  ;;  %v2294_v1 = vadd.f32 %v3586_v56, %v4098_v5  ;;  %v2386_v4 = vmax.f32 %v2384_v59, %v2385_v19  ;;  %v2452_v28 = vadd.f32 %v4111_v39, %v2341_v0 }
 0x301   : > { %v2409_v50 = vmax.f32 %v2407_v42, %v2408_v51  ;;  %v2246_v54 = vpop.f32.mrf.mxu1  ;;  %v2416_v23 = vmax.f32 %v2414_v52, %v2415_v3  ;;  %v2402_v63 = vmax.f32 %v2400_v41, %v2401_v48  ;;  %v2395_v38 = vmax.f32 %v2393_v7, %v2394_v22  ;;  %v4174_v22 = vpop.xlane.xlu1 %1333 }
 0x302   : > { %v2293_v9 = vadd.f32 %v2246_v54, %v4094_v53  ;;  %v2424_v5 = vsel %vm1278_vm2, %v2294_v1, -inf  ;;  %v2367_v53 = vrot.slane %v2366_v6, 1  ;;  %v2376_v42 = vrot.slane %v2375_v58, 1 }
 0x303   : > { %v2410_v49 = vrot.slane %v2409_v50, 2  ;;  %v3589_v8 = vpop.f32.mrf.mxu1  ;;  %v2417_v13 = vrot.slane %v2416_v23, 4  ;;  %v2403_v29 = vrot.slane %v2402_v63, 1  ;;  %v2453_v44 = vadd.f32 %v4111_v39, %v2350_v27 }
 0x304   : > { %v2423_v14 = vsel %vm1278_vm2, %v2293_v9, -inf  ;;  %v2296_v16 = vadd.f32 %v3589_v8, %v1520_v12  ;;  %v2368_v40 = vmax.f32 %v2366_v6, %v2367_v53  ;;  %v2492_v48 = vrot.slane %v2451_v34, 5 }
 0x305   : > { %v2411_v20 = vmax.f32 %v2409_v50, %v2410_v49  ;;  %v2425_v21 = vmax.f32 %v2423_v14, %v2424_v5  ;;  %v2256_v60 = vpop.f32.mrf.mxu1  ;;  %v2418_v24 = vmax.f32 %v2416_v23, %v2417_v13  ;;  %v2404_v25 = vmax.f32 %v2402_v63, %v2403_v29 }
 0x306   : > { %v2295_v26 = vadd.f32 %v2256_v60, %v1516_v18  ;;  %v2433_v32 = vsel %vm1278_vm2, %v2296_v16, -inf  ;;  %v2457_v51 = vadd.f32 %v4111_v39, %v2386_v4  ;;  %v2458_v52 = vadd.f32 %v4111_v39, %v2395_v38 }
 0x307   : > { %v2426_v15 = vrot.slane %v2425_v21, 4  ;;  %v2412_v30 = vrot.slane %v2411_v20, 1  ;;  %v2419_v31 = vrot.slane %v2418_v24, 2  ;;  %v2454_v1 = vadd.f32 %v4111_v39, %v2359_v55 }
 0x308   : > { %v2432_v33 = vsel %vm1278_vm2, %v2295_v26, -inf  ;;  %v2455_v61 = vadd.f32 %v4111_v39, %v2368_v40  ;;  %v2377_v50 = vmax.f32 %v2375_v58, %v2376_v42  ;;  %v2459_v3 = vadd.f32 %v4111_v39, %v2404_v25 }
 0x309   : > { %v2427_v36 = vmax.f32 %v2425_v21, %v2426_v15  ;;  %v2434_v37 = vmax.f32 %v2432_v33, %v2433_v32  ;;  %v2420_v41 = vmax.f32 %v2418_v24, %v2419_v31  ;;  %v2413_v46 = vmax.f32 %v2411_v20, %v2412_v30 }
 0x30a   : > { %v2495_v6 = vrot.slane %v2452_v28, 4  ;;  %v2491_v23 = vsel %vm2490_vm5, %v2489_v2, %v4136_v35  ;;  %v2498_v9 = vrot.slane %v2453_v44, 3  ;;  %v2507_v10 = vrot.slane %v2457_v51, 7  ;;  %v4169_v2 = vpop.xlane.xlu0 %1330 }
 0x30b   : > { %v2428_v43 = vrot.slane %v2427_v36, 2  ;;  %v2435_v45 = vrot.slane %v2434_v37, 4  ;;  %v2421_v47 = vrot.slane %v2420_v41, 1  ;;  %v2460_v7 = vadd.f32 %v4111_v39, %v2413_v46 }
 0x30c   : > { %v2509_v49 = vrot.slane %v2458_v52, 6  ;;  %v2494_v8 = vsel %vm2493_vm6, %v2492_v48, %v2491_v23  ;;  %v2501_v13 = vrot.slane %v2454_v1, 2  ;;  %v2504_v5 = vrot.slane %v2455_v61, 1  ;;  %v3370_v23 = vld [vmem:[%s970_s30] ss:$0 sm:$0xff]  ;;  %s978_s30 = scalar_lea.vmem %s4309_s25, %s4348_s1 }
 0x30d   : > { %v2429_v56 = vmax.f32 %v2427_v36, %v2428_v43  ;;  %v2436_v62 = vmax.f32 %v2434_v37, %v2435_v45  ;;  %v2422_v59 = vmax.f32 %v2420_v41, %v2421_v47  ;;  %v2456_v14 = vadd.f32 %v4111_v39, %v2377_v50 }
 0x30e   : > { %v2511_v16 = vrot.slane %v2459_v3, 5  ;;  %v2513_v11 = vrot.slane %v2460_v7, 4  ;;  %v2497_v35 = vsel %vm2496_vm7, %v2495_v6, %v2494_v8  ;;  %vm2464_vm11 = vcmp.gt.f32.partialorder %v4169_v2, 0.0  ;;  %v2576_v8 = vld [vmem:[%s4346_s5 + $0x18] sm:$0xff] }
 0x30f   : > { %v2430_v0 = vrot.slane %v2429_v56, 1  ;;  %v2437_v54 = vrot.slane %v2436_v62, 2  ;;  %v2461_v12 = vadd.f32 %v4111_v39, %v2422_v59  ;;  %v2500_v19 = vsel %vm2499_vm8, %v2498_v9, %v2497_v35 }
 0x310   : > { %v2508_v21 = vsel %vm2487_vm4, %v2507_v10, %v2456_v14  ;;  %v2503_v53 = vsel %vm2502_vm9, %v2501_v13, %v2500_v19  ;;  %vm2465_vm12 = vcmp.gt.f32.partialorder %v4174_v22, 0.0  ;;  %v2575_v13 = vld [vmem:[%s4346_s5 + $0x10] sm:$0xff]  ;;  %v2574_v14 = vld [vmem:[%s4346_s5 + $0x8] sm:$0xff] }
 0x311   : > { %v2431_v57 = vmax.f32 %v2429_v56, %v2430_v0  ;;  %v2438_v63 = vmax.f32 %v2436_v62, %v2437_v54  ;;  %v2515_v60 = vrot.slane %v2461_v12, 3  ;;  %v2510_v24 = vsel %vm2490_vm5, %v2509_v49, %v2508_v21  ;;  %v3369_v54 = vld [vmem:[%s967_s10] ss:$0 sm:$0xff] }
 0x312   : > { %v2506_v27 = vsel %vm2505_vm10, %v2504_v5, %v2503_v53  ;;  %v2512_v29 = vsel %vm2493_vm6, %v2511_v16, %v2510_v24  ;;  %v4205_v5 = vld [vmem:[%s3927_s0 + $0x8] sm:$0xff]  ;;  %v2573_v16 = vld [vmem:[%s4346_s5] sm:$0xff] }
 0x313   : > { %v2439_v17 = vrot.slane %v2438_v63, 1  ;;  %v2462_v18 = vadd.f32 %v4111_v39, %v2431_v57  ;;  %v2514_v15 = vsel %vm2496_vm7, %v2513_v11, %v2512_v29  ;;  %v2523_v32 = vsel %vm2464_vm11, %v2506_v27, 0.0  ;;  %v2578_v24 = vld [vmem:[%s4297_s13] sm:$0xff] }
 0x314   : > { %v2516_v30 = vsel %vm2499_vm8, %v2515_v60, %v2514_v15  ;;  %v2527_v36 = vsel %vm1278_vm2, %v2523_v32, 0.0  ;;  %v1336_v11 = vmax.f32 %v4174_v22, 1.0  ;;  %v2579_v22 = vld [vmem:[%s4297_s13 + $0x8] sm:$0xff] }
 0x315   : > { %v2440_v20 = vmax.f32 %v2438_v63, %v2439_v17  ;;  %v2517_v26 = vrot.slane %v2462_v18, 2  ;;  %v2581_v17 = vld [vmem:[%s4297_s13 + $0x18] sm:$0xff]  ;;  %v1335_v18 = vmax.f32 %v4169_v2, 1.0  ;;  %v2580_v2 = vld [vmem:[%s4297_s13 + $0x10] sm:$0xff] }
 0x317   : > { %v2463_v58 = vadd.f32 %v4111_v39, %v2440_v20  ;;  %v2518_v33 = vsel %vm2502_vm9, %v2517_v26, %v2516_v30  ;;  %v3668_v26 = vld [vmem:[%s3927_s0] sm:$0xff] }
 0x319   : > { %v2519_v31 = vrot.slane %v2463_v58, 1  ;;  %v3373_v58 = vld [vmem:[%s4296_s12] ss:$0 sm:$0xff] }
 0x31b   : > { %v2520_v34 = vsel %vm2505_vm10, %v2519_v31, %v2518_v33 }
 0x31c   : > { %v2524_v4 = vsel %vm2465_vm12, %v2520_v34, 0.0 }
 0x31d   : > { %v2528_v37 = vsel %vm1278_vm2, %v2524_v4, 0.0 }
 0x31e   : > { %v2529_v39 = vadd.f32 %v2528_v37, %v2527_v36 }
 0x320   : > { %v2530_v55 = vrot.slane %v2529_v39, 4 }
 0x322   : > { %v2531_v38 = vadd.f32 %v2530_v55, %v2529_v39 }
 0x324   : > { %v2532_v40 = vrot.slane %v2531_v38, 2 }
 0x326   : > { %v2533_v41 = vadd.f32 %v2532_v40, %v2531_v38 }
 0x328   : > { %v2534_v42 = vrot.slane %v2533_v41, 1 }
 0x32a   : > { %v2535_v25 = vadd.f32 %v2534_v42, %v2533_v41 }
 0x32c   : > { %v2536_v43 = vmul.f32 0.0625, %v2535_v25 }
 0x32e   : > { %v2537_v45 = vsub.f32 %v2523_v32, %v2536_v43  ;;  %v2538_v28 = vsub.f32 %v2524_v4, %v2536_v43 }
 0x330   : > { %v2539_v44 = vmul.f32 %v2537_v45, %v2537_v45  ;;  %v2540_v46 = vmul.f32 %v2538_v28, %v2538_v28 }
 0x332   : > { %v2541_v47 = vsel %vm1278_vm2, %v2539_v44, 0.0  ;;  %v2542_v48 = vsel %vm1278_vm2, %v2540_v46, 0.0 }
 0x333   : > { %v2543_v51 = vadd.f32 %v2542_v48, %v2541_v47 }
 0x335   : > { %v2544_v56 = vrot.slane %v2543_v51, 4 }
 0x337   : > { %v2545_v62 = vadd.f32 %v2544_v56, %v2543_v51 }
 0x339   : > { %v2546_v52 = vrot.slane %v2545_v62, 2 }
 0x33b   : > { %v2547_v1 = vadd.f32 %v2546_v52, %v2545_v62 }
 0x33d   : > { %v2548_v61 = vrot.slane %v2547_v1, 1 }
 0x33f   : > { %v2549_v59 = vadd.f32 %v2548_v61, %v2547_v1 }
 0x341   : > { %v2550_v50 = vmul.f32 0.0625, %v2549_v59 }
 0x343   : > { %v2551_v3 = vadd.f32 1e-05, %v2550_v50 }
 0x345   : > { %3659 = vrsqrt.f32 %v2551_v3 }
 0x346   : > { %3661 = vrcp.f32 %v1335_v18 }
 0x347   : > { %3663 = vrcp.f32 %v1336_v11 }
 0x352   : > { %v3660_v0 = vpop.eup %3659 }
 0x353   : > { %v2554_v6 = vmul.f32 %v3660_v0, %v2538_v28  ;;  %v2553_v7 = vmul.f32 %v3660_v0, %v2537_v45  ;;  %v4220_v19 = vpop.eup %3661  ;;  %v3378_v0 = vld [vmem:[%s4298_s14] ss:$0 sm:$0xff] }
 0x354   : > { %v4222_v21 = vpop.eup %3663 }
 0x355   : > { %v2562_v9 = vmul.f32 %v3369_v54, %v2554_v6  ;;  %v2561_v10 = vmul.f32 %v3369_v54, %v2553_v7  ;;  %v3379_v7 = vld [vmem:[%s4299_s15] ss:$0 sm:$0xff] }
 0x357   : > { %v2570_v12 = vadd.f32 %v3370_v23, %v2562_v9  ;;  %v2569_v57 = vadd.f32 %v3370_v23, %v2561_v10 }
 0x359   : > { %v2572_v63 = vmax.f32 %v2570_v12, 0.0  ;;  %v2571_v49 = vmax.f32 %v2569_v57, 0.0 }
 0x35b   : > { %3590 = vmatprep.subr.mxu0 %v2572_v63 }
 0x35c   : > { %3591 = vmatpush3.msra.mxu0 %v2572_v63 }
 0x35d   : > { %3592 = vmatprep.subr.mxu0 %v2571_v49 }
 0x35e   : > { %3593 = vmatpush3.msra.mxu0 %v2571_v49 }
 0x35f   : > { %3595 = vmatmul.mubr.msk.f32.vlgmr.msra.gmra.mxu0 %vm1328_vm3, %v4205_v5  ;;  %3597 = vmatprep.subr.mxu0 %v2576_v8 }
 0x360   : > { %3598 = vmatpush3.msra.mxu0 %v2576_v8  ;;  %v2885_v8 = vld [vmem:[%s975_s6 + $0x10] sm:$0xff] }
 0x361   : > { %3599 = vmatprep.subr.mxu0 %v2575_v13 }
 0x362   : > { %3600 = vmatpush3.msra.mxu0 %v2575_v13  ;;  %v2884_v13 = vld [vmem:[%s975_s6 + $0x8] sm:$0xff] }
 0x363   : > { %3601 = vmatprep.subr.mxu0 %v2574_v14 }
 0x364   : > { %3602 = vmatpush3.msra.mxu0 %v2574_v14  ;;  %v2883_v14 = vld [vmem:[%s975_s6] sm:$0xff] }
 0x365   : > { %3603 = vmatprep.subr.mxu0 %v2573_v16 }
 0x366   : > { %3604 = vmatpush3.msra.mxu0 %v2573_v16  ;;  %v2891_v16 = vld [vmem:[%s983_s3 + $0x18] sm:$0xff] }
 0x367   : > { %3608 = vmatprep.subr.mxu0 %v2581_v17 }
 0x41f   : > { %v3596_v35 = vpop.f32.mrf.mxu0 }
 0x420   : > { %v2664_v53 = vmul.f32 %v4222_v21, %v3596_v35  ;;  %v2890_v35 = vld [vmem:[%s983_s3 + $0x10] sm:$0xff] }
 0x421   : > { %v2654_v20 = vpop.f32.mrf.mxu0 }
 0x422   : > { %v2663_v60 = vmul.f32 %v4220_v19, %v2654_v20  ;;  %v2889_v20 = vld [vmem:[%s983_s3 + $0x8] sm:$0xff] }
 0x424   : > { %3605 = vmatprep.mubr.msk.f32.mxu0 %vm1278_vm2, %v2663_v60  ;;  %v2888_v60 = vld [vmem:[%s983_s3] sm:$0xff] }
 0x425   : > { %3606 = vmatmul.mubr.msk.f32.vlgmr.msra.gmra.mxu0 %vm1278_vm2, %v2664_v53 }
 0x426   : > { %3609 = vmatpush3.msra.mxu0 %v2581_v17  ;;  %3616 = vmatprep.mubr.msk.f32.mxu0 %vm1278_vm2, %v2571_v49  ;;  %v2886_v49 = vld [vmem:[%s975_s6 + $0x18] sm:$0xff]  ;;  %s988_s6 = scalar_lea.vmem %s4311_s27, %s3389_s28 }
 0x427   : > { %3610 = vmatprep.subr.mxu0 %v2580_v2 }
 0x428   : > { %3611 = vmatpush3.msra.mxu0 %v2580_v2 }
 0x429   : > { %3612 = vmatprep.subr.mxu0 %v2579_v22 }
 0x42a   : > { %3613 = vmatpush3.msra.mxu0 %v2579_v22 }
 0x42b   : > { %3614 = vmatprep.subr.mxu0 %v2578_v24 }
 0x42c   : > { %3615 = vmatpush3.msra.mxu0 %v2578_v24 }
 0x42d   : > { %3617 = vmatmul.mubr.msk.f32.vlgmr.msra.gmra.mxu0 %vm1278_vm2, %v2572_v63 }
 0x42e   : > { %3623 = vmatprep.mubr.msk.f32.mxu0 %vm1328_vm3, %v3668_v26 }
 0x4e5   : > { %v3607_v27 = vpop.f32.mrf.mxu0 }
 0x4e6   : > { %v2749_v15 = vadd.f32 %v3607_v27, %v3373_v58 }
 0x4e7   : > { %v2743_v29 = vpop.f32.mrf.mxu0 }
 0x4e8   : > { %v2744_v31 = vadd.f32 %v3373_v58, %v2743_v29 }
 0x4ed   : > { %v3618_v30 = vpop.f32.mrf.mxu0 }
 0x4ee   : > { %v2834_v32 = vadd.f32 %v3618_v30, %v2749_v15 }
 0x4ef   : > { %v2824_v33 = vpop.f32.mrf.mxu0 }
 0x4f0   : > { %v2833_v34 = vadd.f32 %v2824_v33, %v2744_v31  ;;  %v2838_v4 = vsel %vm1278_vm2, %v2834_v32, 0.0 }
 0x4f2   : > { %v2837_v36 = vsel %vm1278_vm2, %v2833_v34, 0.0 }
 0x4f3   : > { %v2839_v37 = vadd.f32 %v2838_v4, %v2837_v36 }
 0x4f5   : > { %v2840_v39 = vrot.slane %v2839_v37, 4 }
 0x4f7   : > { %v2841_v55 = vadd.f32 %v2840_v39, %v2839_v37 }
 0x4f9   : > { %v2842_v38 = vrot.slane %v2841_v55, 2 }
 0x4fb   : > { %v2843_v40 = vadd.f32 %v2842_v38, %v2841_v55 }
 0x4fd   : > { %v2844_v41 = vrot.slane %v2843_v40, 1 }
 0x4ff   : > { %v2845_v42 = vadd.f32 %v2844_v41, %v2843_v40 }
 0x501   : > { %v2846_v25 = vmul.f32 0.0625, %v2845_v42 }
 0x503   : > { %v2847_v43 = vsub.f32 %v2833_v34, %v2846_v25  ;;  %v2848_v45 = vsub.f32 %v2834_v32, %v2846_v25 }
 0x505   : > { %v2849_v28 = vmul.f32 %v2847_v43, %v2847_v43  ;;  %v2850_v44 = vmul.f32 %v2848_v45, %v2848_v45 }
 0x507   : > { %v2851_v46 = vsel %vm1278_vm2, %v2849_v28, 0.0  ;;  %v2852_v47 = vsel %vm1278_vm2, %v2850_v44, 0.0 }
 0x508   : > { %v2853_v48 = vadd.f32 %v2852_v47, %v2851_v46 }
 0x50a   : > { %v2854_v51 = vrot.slane %v2853_v48, 4 }
 0x50c   : > { %v2855_v56 = vadd.f32 %v2854_v51, %v2853_v48 }
 0x50e   : > { %v2856_v62 = vrot.slane %v2855_v56, 2 }
 0x510   : > { %v2857_v52 = vadd.f32 %v2856_v62, %v2855_v56 }
 0x512   : > { %v2858_v1 = vrot.slane %v2857_v52, 1 }
 0x514   : > { %v2859_v61 = vadd.f32 %v2858_v1, %v2857_v52 }
 0x516   : > { %v2860_v59 = vmul.f32 0.0625, %v2859_v61 }
 0x518   : > { %v2861_v50 = vadd.f32 1e-05, %v2860_v59 }
 0x51a   : > { %3665 = vrsqrt.f32 %v2861_v50 }
 0x527   : > { %v3666_v3 = vpop.eup %3665 }
 0x528   : > { %v2863_v54 = vmul.f32 %v3666_v3, %v2847_v43  ;;  %v2864_v6 = vmul.f32 %v3666_v3, %v2848_v45 }
 0x52a   : > { %v2872_v23 = vmul.f32 %v3378_v0, %v2864_v6  ;;  %v2871_v9 = vmul.f32 %v3378_v0, %v2863_v54 }
 0x52c   : > { %v2880_v10 = vadd.f32 %v3379_v7, %v2872_v23  ;;  %v2879_v12 = vadd.f32 %v3379_v7, %v2871_v9 }
 0x52e   : > { %v2882_v57 = vmax.f32 %v2880_v10, 0.0  ;;  %v2881_v63 = vmax.f32 %v2879_v12, 0.0 }
 0x530   : > { %3619 = vmatprep.subr.mxu0 %v2882_v57 }
 0x531   : > { %3620 = vmatpush3.msra.mxu0 %v2882_v57 }
 0x532   : > { %3621 = vmatprep.subr.mxu0 %v2881_v63 }
 0x533   : > { %3622 = vmatpush3.msra.mxu0 %v2881_v63 }
 0x534   : > { %3624 = vmatmul.mubr.msk.f32.vlgmr.msra.gmra.mxu0 %vm1328_vm3, %v4205_v5  ;;  %3626 = vmatprep.subr.mxu0 %v2886_v49 }
 0x535   : > { %3627 = vmatpush3.msra.mxu0 %v2886_v49 }
 0x536   : > { %3628 = vmatprep.subr.mxu0 %v2885_v8 }
 0x537   : > { %3629 = vmatpush3.msra.mxu0 %v2885_v8 }
 0x538   : > { %3630 = vmatprep.subr.mxu0 %v2884_v13 }
 0x539   : > { %3631 = vmatpush3.msra.mxu0 %v2884_v13 }
 0x53a   : > { %3632 = vmatprep.subr.mxu0 %v2883_v14 }
 0x53b   : > { %3633 = vmatpush3.msra.mxu0 %v2883_v14 }
 0x53c   : > { %3637 = vmatprep.subr.mxu0 %v2891_v16 }
 0x5f4   : > { %v3625_v17 = vpop.f32.mrf.mxu0 }
 0x5f5   : > { %v2968_v11 = vmul.f32 %v4222_v21, %v3625_v17  ;;  %v3382_v21 = vld [vmem:[%s978_s30] ss:$0 sm:$0xff] }
 0x5f6   : > { %v2958_v18 = vpop.f32.mrf.mxu0 }
 0x5f7   : > { %v2967_v5 = vmul.f32 %v4220_v19, %v2958_v18 }
 0x5f9   : > { %3634 = vmatprep.mubr.msk.f32.mxu0 %vm1278_vm2, %v2967_v5 }
 0x5fa   : > { %3635 = vmatmul.mubr.msk.f32.vlgmr.msra.gmra.mxu0 %vm1278_vm2, %v2968_v11 }
 0x5fb   : > { %3638 = vmatpush3.msra.mxu0 %v2891_v16  ;;  %3645 = vmatprep.mubr.msk.f32.mxu0 %vm1278_vm2, %v2881_v63 }
 0x5fc   : > { %3639 = vmatprep.subr.mxu0 %v2890_v35 }
 0x5fd   : > { %3640 = vmatpush3.msra.mxu0 %v2890_v35 }
 0x5fe   : > { %3641 = vmatprep.subr.mxu0 %v2889_v20 }
 0x5ff   : > { %3642 = vmatpush3.msra.mxu0 %v2889_v20 }
 0x600   : > { %3643 = vmatprep.subr.mxu0 %v2888_v60 }
 0x601   : > { %3644 = vmatpush3.msra.mxu0 %v2888_v60 }
 0x602   : > { %3646 = vmatmul.mubr.msk.f32.vlgmr.msra.gmra.mxu0 %vm1278_vm2, %v2882_v57 }
 0x6ba   : > { %v3636_v19 = vpop.f32.mrf.mxu0 }
 0x6bb   : > { %v3053_v2 = vadd.f32 %v3636_v19, %v3382_v21 }
 0x6bc   : > { %v3047_v53 = vpop.f32.mrf.mxu0 }
 0x6bd   : > { %v3048_v24 = vadd.f32 %v3382_v21, %v3047_v53 }
 0x6c2   : > { %v3647_v22 = vpop.f32.mrf.mxu0 }
 0x6c3   : > { %v3138_v26 = vadd.f32 %v3647_v22, %v3053_v2 }
 0x6c4   : > { %v3128_v27 = vpop.f32.mrf.mxu0 }
 0x6c5   : > { %3140 = vst.msk [vmem:[%s988_s6 + $0x8] sm:$0xff] %vm1328_vm3, %v3138_v26  ;;  %v3137_v58 = vadd.f32 %v3128_v27, %v3048_v24 }
 0x6c7   : > { %3139 = vst.msk [vmem:[%s988_s6] sm:$0xff] %vm1328_vm3, %v3137_v58 }
 0x6c8 PF: > { %s37_s7 = sadd.s32 1, %s3675_s7  }
 0x6c9   : > { %p34_p4 = scmp.ge.s32.totalorder %s37_s7, 5  }
 0x6cb   :  { %36 = sbr.rel (!%p34_p4) target bundleno = 13 (0xd), region = 188 }

</bundles_post_ra>
